<compile_context>
chip_gen: v5e
topology: v5e:2x2
jax: 0.10.0
libtpu: 0.0.40
codegen_flags: <defaults>
</compile_context>

<pallas_src>
import functools

import jax
import jax.numpy as jnp
from jax import lax
from jax.experimental import pallas as pl
from jax.experimental.pallas import tpu as pltpu


# ----------------------------- Pallas kernel -----------------------------

def _gin_kernel(n_edges,                                   # static python int (closure)
                alpha_ref, src_ref, dst_ref,               # SMEM: [L] f32, [E] i32, [E] i32
                x0_ref, e_ref, p_ref, invc_ref,            # VMEM activations / pooling
                w1_ref, s1_ref, t1_ref,                    # VMEM [L,H,2H] bf16, [L,1,2H] f32 x2
                w2_ref, s2_ref, t2_ref,                    # VMEM [L,2H,H] bf16, [L,1,H]  f32 x2
                wout_ref, bout_ref,                        # VMEM [H,C] bf16, [1,C] f32
                out_ref,                                   # VMEM [G,C] f32
                x_scr, agg_scr):                           # VMEM scratch [N,H] f32 x2
    """Fused: L x (GINEConv + MLP(BN folded)) -> mean-pool -> Linear.

    Per layer:
      m_e  = ReLU(x[src[e]] + edge_emb[e])      (dynamic-row gather from VMEM)
      agg  = scatter_add over dst                (dynamic-row accumulate in VMEM scratch)
      h    = alpha*x + agg                       (alpha = 1 + eps, folded host-side)
      x    = ReLU(BN2(ReLU(BN1(h@W1))@W2))       (BN+bias folded into scale/shift)
    """
    num_layers = w1_ref.shape[0]
    x_scr[...] = x0_ref[...]                                         # x resident in VMEM

    for l in range(num_layers):                                      # static unroll (L=3)
        agg_scr[...] = jnp.zeros_like(agg_scr)

        def edge_body(ei, carry):
            s = src_ref[ei]                                          # SMEM scalar reads
            d = dst_ref[ei]
            xs = x_scr[pl.ds(s, 1), :]                               # [1, H] gather
            m = jnp.maximum(xs + e_ref[pl.ds(ei, 1), :], 0.0)        # message
            agg_scr[pl.ds(d, 1), :] = agg_scr[pl.ds(d, 1), :] + m    # scatter-add
            return carry

        lax.fori_loop(0, n_edges, edge_body, 0)

        h = alpha_ref[l] * x_scr[...] + agg_scr[...]                 # f32 elementwise
        h1 = jnp.dot(h.astype(jnp.bfloat16), w1_ref[l],
                     preferred_element_type=jnp.float32)             # [N, 2H]
        h1 = jnp.maximum(h1 * s1_ref[l] + t1_ref[l], 0.0)
        h2 = jnp.dot(h1.astype(jnp.bfloat16), w2_ref[l],
                     preferred_element_type=jnp.float32)             # [N, H]
        x_scr[...] = jnp.maximum(h2 * s2_ref[l] + t2_ref[l], 0.0)
        # dropout: identity in eval mode

    # global_mean_pool: bf16 0/1 sum-pool matmul, f32 1/count applied post-matmul.
    pooled = jnp.dot(p_ref[...], x_scr[...].astype(jnp.bfloat16),
                     preferred_element_type=jnp.float32)             # [G, H]
    pooled = pooled * invc_ref[...]                                  # [G,1] f32 broadcast
    out_ref[...] = jnp.dot(pooled.astype(jnp.bfloat16), wout_ref[...],
                           preferred_element_type=jnp.float32) + bout_ref[...]


# ----------------------------- wrapper -----------------------------

_VMEM = pl.BlockSpec(memory_space=pltpu.MemorySpace.VMEM)
_SMEM = pl.BlockSpec(memory_space=pltpu.MemorySpace.SMEM)


def gin_fused(alpha, src, dst, x0, e, P, invc,
              w1, s1, t1, w2, s2, t2, wout, bout, *, num_edges):
    L, h_pad, h2_pad = w1.shape
    n_pad = x0.shape[0]
    g_pad = P.shape[0]
    c_pad = wout.shape[1]

    # Index-gather cost model (no dense E*N terms).
    flops = L * (4 * num_edges * h_pad                         # gather add/relu + scatter add
                 + 2 * n_pad * h_pad * h2_pad                  # h @ W1
                 + 2 * n_pad * h2_pad * h_pad                  # h1 @ W2
                 + 8 * n_pad * max(h_pad, h2_pad))             # scale/shift/relu/alpha
    flops += 2 * g_pad * n_pad * h_pad + 2 * g_pad * h_pad * c_pad
    operands = (alpha, src, dst, x0, e, P, invc, w1, s1, t1, w2, s2, t2, wout, bout)
    bytes_accessed = sum(int(a.size) * a.dtype.itemsize for a in operands)
    bytes_accessed += g_pad * c_pad * 4

    # VMEM budget: resident inputs + x/agg scratch + output, x2 headroom, capped at 48 MiB
    # (leaves room for Mosaic scratch on v7x's 64 MiB physical VMEM).
    resident = sum(int(a.size) * a.dtype.itemsize
                   for a in (x0, e, P, invc, w1, s1, t1, w2, s2, t2, wout, bout))
    resident += 2 * int(x0.size) * 4 + g_pad * c_pad * 4
    vmem_limit = int(min(max(2 * resident, 8 * 1024 * 1024), 48 * 1024 * 1024))

    kernel = functools.partial(_gin_kernel, int(num_edges))
    return pl.pallas_call(
        kernel,
        out_shape=jax.ShapeDtypeStruct((g_pad, c_pad), jnp.float32),
        in_specs=[_SMEM, _SMEM, _SMEM] + [_VMEM] * 12,
        out_specs=_VMEM,
        scratch_shapes=[pltpu.VMEM((n_pad, h_pad), jnp.float32),     # x (resident)
                        pltpu.VMEM((n_pad, h_pad), jnp.float32)],    # agg accumulator
        compiler_params=pltpu.CompilerParams(vmem_limit_bytes=vmem_limit),
        cost_estimate=pl.CostEstimate(flops=int(flops), transcendentals=0,
                                      bytes_accessed=int(bytes_accessed)),
    )(alpha, src, dst, x0, e, P, invc, w1, s1, t1, w2, s2, t2, wout, bout)


# ----------------------------- parameter / glue setup -----------------------------

def _round_up(n, m):
    return ((n + m - 1) // m) * m


def _pad2(a, shape):
    return jnp.pad(a, [(0, s - d) for d, s in zip(a.shape, shape)])


def fold_linear_bn(b_lin, gamma, beta, running_mean, running_var, bn_eps=1e-5):
    """Fold Linear bias + eval-mode BatchNorm into per-channel scale/shift."""
    scale = gamma / jnp.sqrt(running_var + bn_eps)
    shift = (b_lin - running_mean) * scale + beta
    return scale, shift                                  # [C] each


def make_params(key, hidden, out_channels, num_layers, atom_vocabs, bond_vocabs):
    h_pad = _round_up(hidden, 128)
    h2_pad = _round_up(2 * hidden, 128)
    c_pad = _round_up(out_channels, 128)

    params = {"hidden": hidden, "out_channels": out_channels,
              "h_pad": h_pad, "h2_pad": h2_pad, "c_pad": c_pad}
    keys = iter(jax.random.split(key, 64))

    # Atom/Bond encoder tables, zero-padded on the hidden axis to 128 lanes.
    params["atom_emb"] = [
        _pad2(0.1 * jax.random.normal(next(keys), (v, hidden), jnp.float32), (v, h_pad))
        for v in atom_vocabs]
    params["bond_emb"] = [
        _pad2(0.1 * jax.random.normal(next(keys), (v, hidden), jnp.float32), (v, h_pad))
        for v in bond_vocabs]

    w1s, s1s, t1s, w2s, s2s, t2s, alphas = [], [], [], [], [], [], []
    for _ in range(num_layers):
        w1 = 0.1 * jax.random.normal(next(keys), (hidden, 2 * hidden), jnp.float32)
        b1 = 0.05 * jax.random.normal(next(keys), (2 * hidden,), jnp.float32)
        g1 = 1.0 + 0.1 * jax.random.normal(next(keys), (2 * hidden,), jnp.float32)
        be1 = 0.05 * jax.random.normal(next(keys), (2 * hidden,), jnp.float32)
        rm1 = 0.05 * jax.random.normal(next(keys), (2 * hidden,), jnp.float32)
        rv1 = 0.5 + jax.random.uniform(next(keys), (2 * hidden,), jnp.float32)

        w2 = 0.1 * jax.random.normal(next(keys), (2 * hidden, hidden), jnp.float32)
        b2 = 0.05 * jax.random.normal(next(keys), (hidden,), jnp.float32)
        g2 = 1.0 + 0.1 * jax.random.normal(next(keys), (hidden,), jnp.float32)
        be2 = 0.05 * jax.random.normal(next(keys), (hidden,), jnp.float32)
        rm2 = 0.05 * jax.random.normal(next(keys), (hidden,), jnp.float32)
        rv2 = 0.5 + jax.random.uniform(next(keys), (hidden,), jnp.float32)

        sc1, sh1 = fold_linear_bn(b1, g1, be1, rm1, rv1)
        sc2, sh2 = fold_linear_bn(b2, g2, be2, rm2, rv2)
        eps = 0.1 * jax.random.normal(next(keys), (), jnp.float32)   # train_eps=True init

        # pad: weights zero-padded; padded channels get scale=shift=0 -> stay zero.
        w1s.append(_pad2(w1, (h_pad, h2_pad)).astype(jnp.bfloat16))
        s1s.append(_pad2(sc1[None, :], (1, h2_pad)))
        t1s.append(_pad2(sh1[None, :], (1, h2_pad)))
        w2s.append(_pad2(w2, (h2_pad, h_pad)).astype(jnp.bfloat16))
        s2s.append(_pad2(sc2[None, :], (1, h_pad)))
        t2s.append(_pad2(sh2[None, :], (1, h_pad)))
        alphas.append(1.0 + eps)                                      # fold (1 + eps)

    params["w1"] = jnp.stack(w1s)            # [L, H_pad, 2H_pad] bf16
    params["s1"] = jnp.stack(s1s)            # [L, 1, 2H_pad]     f32
    params["t1"] = jnp.stack(t1s)
    params["w2"] = jnp.stack(w2s)            # [L, 2H_pad, H_pad] bf16
    params["s2"] = jnp.stack(s2s)
    params["t2"] = jnp.stack(t2s)
    params["alpha"] = jnp.stack(alphas).astype(jnp.float32)           # [L]

    lin_w = 0.1 * jax.random.normal(next(keys), (hidden, out_channels), jnp.float32)
    lin_b = 0.05 * jax.random.normal(next(keys), (out_channels,), jnp.float32)
    params["lin_w"] = _pad2(lin_w, (h_pad, c_pad)).astype(jnp.bfloat16)  # bf16 head
    params["lin_b"] = _pad2(lin_b[None, :], (1, c_pad))                  # f32 bias/shift
    return params


def gin_forward(params, x_atoms, edge_attr, src, dst, batch, num_graphs):
    N = x_atoms.shape[0]
    E = edge_attr.shape[0]
    h_pad = params["h_pad"]
    n_pad = _round_up(N, 128)         # lane-dense contraction dim for the pool matmul
    e_pad = _round_up(E, 8)           # f32 sublane packing for edge embeddings
    g_pad = _round_up(max(num_graphs, 1), 8)

    # AtomEncoder / BondEncoder: sum of per-feature embedding lookups (plain-JAX glue).
    x = sum(tab[x_atoms[:, f]] for f, tab in enumerate(params["atom_emb"]))     # [N, H_pad]
    e = sum(tab[edge_attr[:, f]] for f, tab in enumerate(params["bond_emb"]))   # [E, H_pad]
    x = _pad2(x, (n_pad, h_pad))
    e = _pad2(e, (e_pad, h_pad))

    # Sum-pool selector built directly in bf16 (exact 0/1) and target orientation;
    # 1/count kept as an f32 column applied post-matmul inside the kernel.
    gids = jnp.arange(g_pad, dtype=batch.dtype)
    P = _pad2((batch[None, :] == gids[:, None]).astype(jnp.bfloat16),
              (g_pad, n_pad))                                         # [G_pad, N_pad]
    counts = jnp.maximum(jnp.sum(batch[None, :] == gids[:, None], axis=1), 1)
    invc = (1.0 / counts.astype(jnp.float32))[:, None]                # [G_pad, 1]

    out = gin_fused(params["alpha"],
                    src.astype(jnp.int32), dst.astype(jnp.int32),
                    x, e, P, invc,
                    params["w1"], params["s1"], params["t1"],
                    params["w2"], params["s2"], params["t2"],
                    params["lin_w"], params["lin_b"],
                    num_edges=E)                                      # [G_pad, C_pad]
    return out[:num_graphs, :params["out_channels"]]


# ----------------------------- main -----------------------------

if __name__ == "__main__":
    hidden_channels = 32
    out_channels = 8
    num_layers = 3
    N = 16            # nodes
    E = 32            # edges
    num_graphs = 2
    atom_vocabs = (10, 5, 7)   # synthetic AtomEncoder feature vocab sizes
    bond_vocabs = (5, 4, 3)    # synthetic BondEncoder feature vocab sizes

    key = jax.random.PRNGKey(0)
    k_param, k_x, k_e, k_src, k_dst = jax.random.split(key, 5)

    params = make_params(k_param, hidden_channels, out_channels, num_layers,
                         atom_vocabs, bond_vocabs)

    x_atoms = jnp.stack(
        [jax.random.randint(jax.random.fold_in(k_x, f), (N,), 0, v)
         for f, v in enumerate(atom_vocabs)], axis=1).astype(jnp.int32)   # [N, 3]
    edge_attr = jnp.stack(
        [jax.random.randint(jax.random.fold_in(k_e, f), (E,), 0, v)
         for f, v in enumerate(bond_vocabs)], axis=1).astype(jnp.int32)   # [E, 3]
    src = jax.random.randint(k_src, (E,), 0, N).astype(jnp.int32)
    dst = jax.random.randint(k_dst, (E,), 0, N).astype(jnp.int32)
    batch = jnp.concatenate([jnp.zeros((N // 2,), jnp.int32),
                             jnp.ones((N - N // 2,), jnp.int32)])          # [N]

    out = gin_forward(params, x_atoms, edge_attr, src, dst, batch, num_graphs)
    out = jax.block_until_ready(out)
    assert out.shape == (num_graphs, out_channels)
    assert bool(jnp.all(jnp.isfinite(out)))
    print("KERNEL_OK")
</pallas_src>

<mosaic_0001>
module attributes {stable_mosaic.version = 11 : i64} {
  func.func @_gin_kernel(%arg0: memref<3xf32, #tpu.memory_space<smem>>, %arg1: memref<32xi32, #tpu.memory_space<smem>>, %arg2: memref<32xi32, #tpu.memory_space<smem>>, %arg3: memref<128x128xf32, #tpu.memory_space<vmem>>, %arg4: memref<32x128xf32, #tpu.memory_space<vmem>>, %arg5: memref<8x128xbf16, #tpu.memory_space<vmem>>, %arg6: memref<8x1xf32, #tpu.memory_space<vmem>>, %arg7: memref<3x128x128xbf16, #tpu.memory_space<vmem>>, %arg8: memref<3x1x128xf32, #tpu.memory_space<vmem>>, %arg9: memref<3x1x128xf32, #tpu.memory_space<vmem>>, %arg10: memref<3x128x128xbf16, #tpu.memory_space<vmem>>, %arg11: memref<3x1x128xf32, #tpu.memory_space<vmem>>, %arg12: memref<3x1x128xf32, #tpu.memory_space<vmem>>, %arg13: memref<128x128xbf16, #tpu.memory_space<vmem>>, %arg14: memref<1x128xf32, #tpu.memory_space<vmem>>, %arg15: memref<8x128xf32, #tpu.memory_space<vmem>>, %arg16: memref<128x128xf32, #tpu.memory_space<vmem>>, %arg17: memref<128x128xf32, #tpu.memory_space<vmem>>) attributes {dimension_semantics = [], scalar_prefetch = 0 : i64, scratch_operands = 2 : i64, tpu.core_type = #tpu.core_type<tc>} {
    %c0 = arith.constant 0 : index
    %c0_0 = arith.constant 0 : index
    %0 = vector.load %arg3[%c0, %c0_0] : memref<128x128xf32, #tpu.memory_space<vmem>>, vector<128x128xf32>
    %c0_1 = arith.constant 0 : index
    %c0_2 = arith.constant 0 : index
    %1 = vector.load %arg16[%c0_1, %c0_2] : memref<128x128xf32, #tpu.memory_space<vmem>>, vector<128x128xf32>
    tpu.vector_store %arg16[%c0_1, %c0_2], %0 {strides = array<i32>} : memref<128x128xf32, #tpu.memory_space<vmem>>, vector<128x128xf32>,
    %cst = arith.constant 0.000000e+00 : f32
    %2 = vector.broadcast %cst : f32 to vector<128x128xf32>
    %c0_3 = arith.constant 0 : index
    %c0_4 = arith.constant 0 : index
    %3 = vector.load %arg17[%c0_3, %c0_4] : memref<128x128xf32, #tpu.memory_space<vmem>>, vector<128x128xf32>
    tpu.vector_store %arg17[%c0_3, %c0_4], %2 {strides = array<i32>} : memref<128x128xf32, #tpu.memory_space<vmem>>, vector<128x128xf32>,
    %c0_i32 = arith.constant 0 : i32
    %c32_i32 = arith.constant 32 : i32
    %4 = arith.addi %c0_i32, %c32_i32 : i32
    %c1_i32 = arith.constant 1 : i32
    scf.for %arg18 = %c0_i32 to %4 step %c1_i32  : i32 {
      %130 = arith.index_cast %arg18 : i32 to index
      %131 = memref.load %arg1[%130] : memref<32xi32, #tpu.memory_space<smem>>
      %132 = arith.index_cast %arg18 : i32 to index
      %133 = memref.load %arg2[%132] : memref<32xi32, #tpu.memory_space<smem>>
      %134 = arith.index_cast %131 : i32 to index
      %c0_119 = arith.constant 0 : index
      %135 = vector.load %arg16[%134, %c0_119] : memref<128x128xf32, #tpu.memory_space<vmem>>, vector<1x128xf32>
      %136 = arith.index_cast %arg18 : i32 to index
      %c0_120 = arith.constant 0 : index
      %137 = vector.load %arg4[%136, %c0_120] : memref<32x128xf32, #tpu.memory_space<vmem>>, vector<1x128xf32>
      %138 = arith.addf %135, %137 : vector<1x128xf32>
      %cst_121 = arith.constant 0.000000e+00 : f32
      %139 = vector.broadcast %cst_121 : f32 to vector<1x128xf32>
      %140 = arith.maximumf %138, %139 : vector<1x128xf32>
      %141 = arith.index_cast %133 : i32 to index
      %c0_122 = arith.constant 0 : index
      %142 = vector.load %arg17[%141, %c0_122] : memref<128x128xf32, #tpu.memory_space<vmem>>, vector<1x128xf32>
      %143 = arith.addf %142, %140 : vector<1x128xf32>
      %144 = arith.index_cast %133 : i32 to index
      %c0_123 = arith.constant 0 : index
      %145 = vector.load %arg17[%144, %c0_123] : memref<128x128xf32, #tpu.memory_space<vmem>>, vector<1x128xf32>
      tpu.vector_store %arg17[%144, %c0_123], %143 {strides = array<i32>} : memref<128x128xf32, #tpu.memory_space<vmem>>, vector<1x128xf32>,
    }
    %c32_i32_5 = arith.constant 32 : i32
    %c0_6 = arith.constant 0 : index
    %5 = memref.load %arg0[%c0_6] : memref<3xf32, #tpu.memory_space<smem>>
    %c0_7 = arith.constant 0 : index
    %c0_8 = arith.constant 0 : index
    %6 = vector.load %arg16[%c0_7, %c0_8] : memref<128x128xf32, #tpu.memory_space<vmem>>, vector<128x128xf32>
    %7 = vector.broadcast %5 : f32 to vector<128x128xf32>
    %8 = arith.mulf %7, %6 : vector<128x128xf32>
    %c0_9 = arith.constant 0 : index
    %c0_10 = arith.constant 0 : index
    %9 = vector.load %arg17[%c0_9, %c0_10] : memref<128x128xf32, #tpu.memory_space<vmem>>, vector<128x128xf32>
    %10 = arith.addf %8, %9 : vector<128x128xf32>
    %11 = arith.truncf %10 : vector<128x128xf32> to vector<128x128xbf16>
    %c0_11 = arith.constant 0 : index
    %c0_12 = arith.constant 0 : index
    %c0_13 = arith.constant 0 : index
    %12 = vector.load %arg7[%c0_11, %c0_12, %c0_13] : memref<3x128x128xbf16, #tpu.memory_space<vmem>>, vector<1x128x128xbf16>
    %13 = vector.shape_cast %12 : vector<1x128x128xbf16> to vector<128x128xbf16>
    %cst_14 = arith.constant dense<0.000000e+00> : vector<128x128xf32>
    %14 = tpu.matmul %11, %13, %cst_14 {dimension_numbers = #tpu.dot_dimension_numbers<[1], [0], [0], [1], [0, 0, 1, 1], [], []>} : vector<128x128xbf16>, vector<128x128xbf16>, vector<128x128xf32> -> vector<128x128xf32>
    %c0_15 = arith.constant 0 : index
    %c0_16 = arith.constant 0 : index
    %c0_17 = arith.constant 0 : index
    %15 = vector.load %arg8[%c0_15, %c0_16, %c0_17] : memref<3x1x128xf32, #tpu.memory_space<vmem>>, vector<1x1x128xf32>
    %16 = vector.shape_cast %15 : vector<1x1x128xf32> to vector<1x128xf32>
    %17 = vector.broadcast %16 : vector<1x128xf32> to vector<128x128xf32>
    %18 = arith.mulf %14, %17 : vector<128x128xf32>
    %c0_18 = arith.constant 0 : index
    %c0_19 = arith.constant 0 : index
    %c0_20 = arith.constant 0 : index
    %19 = vector.load %arg9[%c0_18, %c0_19, %c0_20] : memref<3x1x128xf32, #tpu.memory_space<vmem>>, vector<1x1x128xf32>
    %20 = vector.shape_cast %19 : vector<1x1x128xf32> to vector<1x128xf32>
    %21 = vector.broadcast %20 : vector<1x128xf32> to vector<128x128xf32>
    %22 = arith.addf %18, %21 : vector<128x128xf32>
    %cst_21 = arith.constant 0.000000e+00 : f32
    %23 = vector.broadcast %cst_21 : f32 to vector<128x128xf32>
    %24 = arith.maximumf %22, %23 : vector<128x128xf32>
    %25 = arith.truncf %24 : vector<128x128xf32> to vector<128x128xbf16>
    %c0_22 = arith.constant 0 : index
    %c0_23 = arith.constant 0 : index
    %c0_24 = arith.constant 0 : index
    %26 = vector.load %arg10[%c0_22, %c0_23, %c0_24] : memref<3x128x128xbf16, #tpu.memory_space<vmem>>, vector<1x128x128xbf16>
    %27 = vector.shape_cast %26 : vector<1x128x128xbf16> to vector<128x128xbf16>
    %cst_25 = arith.constant dense<0.000000e+00> : vector<128x128xf32>
    %28 = tpu.matmul %25, %27, %cst_25 {dimension_numbers = #tpu.dot_dimension_numbers<[1], [0], [0], [1], [0, 0, 1, 1], [], []>} : vector<128x128xbf16>, vector<128x128xbf16>, vector<128x128xf32> -> vector<128x128xf32>
    %c0_26 = arith.constant 0 : index
    %c0_27 = arith.constant 0 : index
    %c0_28 = arith.constant 0 : index
    %29 = vector.load %arg11[%c0_26, %c0_27, %c0_28] : memref<3x1x128xf32, #tpu.memory_space<vmem>>, vector<1x1x128xf32>
    %30 = vector.shape_cast %29 : vector<1x1x128xf32> to vector<1x128xf32>
    %31 = vector.broadcast %30 : vector<1x128xf32> to vector<128x128xf32>
    %32 = arith.mulf %28, %31 : vector<128x128xf32>
    %c0_29 = arith.constant 0 : index
    %c0_30 = arith.constant 0 : index
    %c0_31 = arith.constant 0 : index
    %33 = vector.load %arg12[%c0_29, %c0_30, %c0_31] : memref<3x1x128xf32, #tpu.memory_space<vmem>>, vector<1x1x128xf32>
    %34 = vector.shape_cast %33 : vector<1x1x128xf32> to vector<1x128xf32>
    %35 = vector.broadcast %34 : vector<1x128xf32> to vector<128x128xf32>
    %36 = arith.addf %32, %35 : vector<128x128xf32>
    %cst_32 = arith.constant 0.000000e+00 : f32
    %37 = vector.broadcast %cst_32 : f32 to vector<128x128xf32>
    %38 = arith.maximumf %36, %37 : vector<128x128xf32>
    %c0_33 = arith.constant 0 : index
    %c0_34 = arith.constant 0 : index
    %39 = vector.load %arg16[%c0_33, %c0_34] : memref<128x128xf32, #tpu.memory_space<vmem>>, vector<128x128xf32>
    tpu.vector_store %arg16[%c0_33, %c0_34], %38 {strides = array<i32>} : memref<128x128xf32, #tpu.memory_space<vmem>>, vector<128x128xf32>,
    %cst_35 = arith.constant 0.000000e+00 : f32
    %40 = vector.broadcast %cst_35 : f32 to vector<128x128xf32>
    %c0_36 = arith.constant 0 : index
    %c0_37 = arith.constant 0 : index
    %41 = vector.load %arg17[%c0_36, %c0_37] : memref<128x128xf32, #tpu.memory_space<vmem>>, vector<128x128xf32>
    tpu.vector_store %arg17[%c0_36, %c0_37], %40 {strides = array<i32>} : memref<128x128xf32, #tpu.memory_space<vmem>>, vector<128x128xf32>,
    %c0_i32_38 = arith.constant 0 : i32
    %c32_i32_39 = arith.constant 32 : i32
    %42 = arith.addi %c0_i32_38, %c32_i32_39 : i32
    %c1_i32_40 = arith.constant 1 : i32
    scf.for %arg18 = %c0_i32_38 to %42 step %c1_i32_40  : i32 {
      %130 = arith.index_cast %arg18 : i32 to index
      %131 = memref.load %arg1[%130] : memref<32xi32, #tpu.memory_space<smem>>
      %132 = arith.index_cast %arg18 : i32 to index
      %133 = memref.load %arg2[%132] : memref<32xi32, #tpu.memory_space<smem>>
      %134 = arith.index_cast %131 : i32 to index
      %c0_119 = arith.constant 0 : index
      %135 = vector.load %arg16[%134, %c0_119] : memref<128x128xf32, #tpu.memory_space<vmem>>, vector<1x128xf32>
      %136 = arith.index_cast %arg18 : i32 to index
      %c0_120 = arith.constant 0 : index
      %137 = vector.load %arg4[%136, %c0_120] : memref<32x128xf32, #tpu.memory_space<vmem>>, vector<1x128xf32>
      %138 = arith.addf %135, %137 : vector<1x128xf32>
      %cst_121 = arith.constant 0.000000e+00 : f32
      %139 = vector.broadcast %cst_121 : f32 to vector<1x128xf32>
      %140 = arith.maximumf %138, %139 : vector<1x128xf32>
      %141 = arith.index_cast %133 : i32 to index
      %c0_122 = arith.constant 0 : index
      %142 = vector.load %arg17[%141, %c0_122] : memref<128x128xf32, #tpu.memory_space<vmem>>, vector<1x128xf32>
      %143 = arith.addf %142, %140 : vector<1x128xf32>
      %144 = arith.index_cast %133 : i32 to index
      %c0_123 = arith.constant 0 : index
      %145 = vector.load %arg17[%144, %c0_123] : memref<128x128xf32, #tpu.memory_space<vmem>>, vector<1x128xf32>
      tpu.vector_store %arg17[%144, %c0_123], %143 {strides = array<i32>} : memref<128x128xf32, #tpu.memory_space<vmem>>, vector<1x128xf32>,
    }
    %c32_i32_41 = arith.constant 32 : i32
    %c1 = arith.constant 1 : index
    %43 = memref.load %arg0[%c1] : memref<3xf32, #tpu.memory_space<smem>>
    %c0_42 = arith.constant 0 : index
    %c0_43 = arith.constant 0 : index
    %44 = vector.load %arg16[%c0_42, %c0_43] : memref<128x128xf32, #tpu.memory_space<vmem>>, vector<128x128xf32>
    %45 = vector.broadcast %43 : f32 to vector<128x128xf32>
    %46 = arith.mulf %45, %44 : vector<128x128xf32>
    %c0_44 = arith.constant 0 : index
    %c0_45 = arith.constant 0 : index
    %47 = vector.load %arg17[%c0_44, %c0_45] : memref<128x128xf32, #tpu.memory_space<vmem>>, vector<128x128xf32>
    %48 = arith.addf %46, %47 : vector<128x128xf32>
    %49 = arith.truncf %48 : vector<128x128xf32> to vector<128x128xbf16>
    %c1_46 = arith.constant 1 : index
    %c0_47 = arith.constant 0 : index
    %c0_48 = arith.constant 0 : index
    %50 = vector.load %arg7[%c1_46, %c0_47, %c0_48] : memref<3x128x128xbf16, #tpu.memory_space<vmem>>, vector<1x128x128xbf16>
    %51 = vector.shape_cast %50 : vector<1x128x128xbf16> to vector<128x128xbf16>
    %cst_49 = arith.constant dense<0.000000e+00> : vector<128x128xf32>
    %52 = tpu.matmul %49, %51, %cst_49 {dimension_numbers = #tpu.dot_dimension_numbers<[1], [0], [0], [1], [0, 0, 1, 1], [], []>} : vector<128x128xbf16>, vector<128x128xbf16>, vector<128x128xf32> -> vector<128x128xf32>
    %c1_50 = arith.constant 1 : index
    %c0_51 = arith.constant 0 : index
    %c0_52 = arith.constant 0 : index
    %53 = vector.load %arg8[%c1_50, %c0_51, %c0_52] : memref<3x1x128xf32, #tpu.memory_space<vmem>>, vector<1x1x128xf32>
    %54 = vector.shape_cast %53 : vector<1x1x128xf32> to vector<1x128xf32>
    %55 = vector.broadcast %54 : vector<1x128xf32> to vector<128x128xf32>
    %56 = arith.mulf %52, %55 : vector<128x128xf32>
    %c1_53 = arith.constant 1 : index
    %c0_54 = arith.constant 0 : index
    %c0_55 = arith.constant 0 : index
    %57 = vector.load %arg9[%c1_53, %c0_54, %c0_55] : memref<3x1x128xf32, #tpu.memory_space<vmem>>, vector<1x1x128xf32>
    %58 = vector.shape_cast %57 : vector<1x1x128xf32> to vector<1x128xf32>
    %59 = vector.broadcast %58 : vector<1x128xf32> to vector<128x128xf32>
    %60 = arith.addf %56, %59 : vector<128x128xf32>
    %cst_56 = arith.constant 0.000000e+00 : f32
    %61 = vector.broadcast %cst_56 : f32 to vector<128x128xf32>
    %62 = arith.maximumf %60, %61 : vector<128x128xf32>
    %63 = arith.truncf %62 : vector<128x128xf32> to vector<128x128xbf16>
    %c1_57 = arith.constant 1 : index
    %c0_58 = arith.constant 0 : index
    %c0_59 = arith.constant 0 : index
    %64 = vector.load %arg10[%c1_57, %c0_58, %c0_59] : memref<3x128x128xbf16, #tpu.memory_space<vmem>>, vector<1x128x128xbf16>
    %65 = vector.shape_cast %64 : vector<1x128x128xbf16> to vector<128x128xbf16>
    %cst_60 = arith.constant dense<0.000000e+00> : vector<128x128xf32>
    %66 = tpu.matmul %63, %65, %cst_60 {dimension_numbers = #tpu.dot_dimension_numbers<[1], [0], [0], [1], [0, 0, 1, 1], [], []>} : vector<128x128xbf16>, vector<128x128xbf16>, vector<128x128xf32> -> vector<128x128xf32>
    %c1_61 = arith.constant 1 : index
    %c0_62 = arith.constant 0 : index
    %c0_63 = arith.constant 0 : index
    %67 = vector.load %arg11[%c1_61, %c0_62, %c0_63] : memref<3x1x128xf32, #tpu.memory_space<vmem>>, vector<1x1x128xf32>
    %68 = vector.shape_cast %67 : vector<1x1x128xf32> to vector<1x128xf32>
    %69 = vector.broadcast %68 : vector<1x128xf32> to vector<128x128xf32>
    %70 = arith.mulf %66, %69 : vector<128x128xf32>
    %c1_64 = arith.constant 1 : index
    %c0_65 = arith.constant 0 : index
    %c0_66 = arith.constant 0 : index
    %71 = vector.load %arg12[%c1_64, %c0_65, %c0_66] : memref<3x1x128xf32, #tpu.memory_space<vmem>>, vector<1x1x128xf32>
    %72 = vector.shape_cast %71 : vector<1x1x128xf32> to vector<1x128xf32>
    %73 = vector.broadcast %72 : vector<1x128xf32> to vector<128x128xf32>
    %74 = arith.addf %70, %73 : vector<128x128xf32>
    %cst_67 = arith.constant 0.000000e+00 : f32
    %75 = vector.broadcast %cst_67 : f32 to vector<128x128xf32>
    %76 = arith.maximumf %74, %75 : vector<128x128xf32>
    %c0_68 = arith.constant 0 : index
    %c0_69 = arith.constant 0 : index
    %77 = vector.load %arg16[%c0_68, %c0_69] : memref<128x128xf32, #tpu.memory_space<vmem>>, vector<128x128xf32>
    tpu.vector_store %arg16[%c0_68, %c0_69], %76 {strides = array<i32>} : memref<128x128xf32, #tpu.memory_space<vmem>>, vector<128x128xf32>,
    %cst_70 = arith.constant 0.000000e+00 : f32
    %78 = vector.broadcast %cst_70 : f32 to vector<128x128xf32>
    %c0_71 = arith.constant 0 : index
    %c0_72 = arith.constant 0 : index
    %79 = vector.load %arg17[%c0_71, %c0_72] : memref<128x128xf32, #tpu.memory_space<vmem>>, vector<128x128xf32>
    tpu.vector_store %arg17[%c0_71, %c0_72], %78 {strides = array<i32>} : memref<128x128xf32, #tpu.memory_space<vmem>>, vector<128x128xf32>,
    %c0_i32_73 = arith.constant 0 : i32
    %c32_i32_74 = arith.constant 32 : i32
    %80 = arith.addi %c0_i32_73, %c32_i32_74 : i32
    %c1_i32_75 = arith.constant 1 : i32
    scf.for %arg18 = %c0_i32_73 to %80 step %c1_i32_75  : i32 {
      %130 = arith.index_cast %arg18 : i32 to index
      %131 = memref.load %arg1[%130] : memref<32xi32, #tpu.memory_space<smem>>
      %132 = arith.index_cast %arg18 : i32 to index
      %133 = memref.load %arg2[%132] : memref<32xi32, #tpu.memory_space<smem>>
      %134 = arith.index_cast %131 : i32 to index
      %c0_119 = arith.constant 0 : index
      %135 = vector.load %arg16[%134, %c0_119] : memref<128x128xf32, #tpu.memory_space<vmem>>, vector<1x128xf32>
      %136 = arith.index_cast %arg18 : i32 to index
      %c0_120 = arith.constant 0 : index
      %137 = vector.load %arg4[%136, %c0_120] : memref<32x128xf32, #tpu.memory_space<vmem>>, vector<1x128xf32>
      %138 = arith.addf %135, %137 : vector<1x128xf32>
      %cst_121 = arith.constant 0.000000e+00 : f32
      %139 = vector.broadcast %cst_121 : f32 to vector<1x128xf32>
      %140 = arith.maximumf %138, %139 : vector<1x128xf32>
      %141 = arith.index_cast %133 : i32 to index
      %c0_122 = arith.constant 0 : index
      %142 = vector.load %arg17[%141, %c0_122] : memref<128x128xf32, #tpu.memory_space<vmem>>, vector<1x128xf32>
      %143 = arith.addf %142, %140 : vector<1x128xf32>
      %144 = arith.index_cast %133 : i32 to index
      %c0_123 = arith.constant 0 : index
      %145 = vector.load %arg17[%144, %c0_123] : memref<128x128xf32, #tpu.memory_space<vmem>>, vector<1x128xf32>
      tpu.vector_store %arg17[%144, %c0_123], %143 {strides = array<i32>} : memref<128x128xf32, #tpu.memory_space<vmem>>, vector<1x128xf32>,
    }
    %c32_i32_76 = arith.constant 32 : i32
    %c2 = arith.constant 2 : index
    %81 = memref.load %arg0[%c2] : memref<3xf32, #tpu.memory_space<smem>>
    %c0_77 = arith.constant 0 : index
    %c0_78 = arith.constant 0 : index
    %82 = vector.load %arg16[%c0_77, %c0_78] : memref<128x128xf32, #tpu.memory_space<vmem>>, vector<128x128xf32>
    %83 = vector.broadcast %81 : f32 to vector<128x128xf32>
    %84 = arith.mulf %83, %82 : vector<128x128xf32>
    %c0_79 = arith.constant 0 : index
    %c0_80 = arith.constant 0 : index
    %85 = vector.load %arg17[%c0_79, %c0_80] : memref<128x128xf32, #tpu.memory_space<vmem>>, vector<128x128xf32>
    %86 = arith.addf %84, %85 : vector<128x128xf32>
    %87 = arith.truncf %86 : vector<128x128xf32> to vector<128x128xbf16>
    %c2_81 = arith.constant 2 : index
    %c0_82 = arith.constant 0 : index
    %c0_83 = arith.constant 0 : index
    %88 = vector.load %arg7[%c2_81, %c0_82, %c0_83] : memref<3x128x128xbf16, #tpu.memory_space<vmem>>, vector<1x128x128xbf16>
    %89 = vector.shape_cast %88 : vector<1x128x128xbf16> to vector<128x128xbf16>
    %cst_84 = arith.constant dense<0.000000e+00> : vector<128x128xf32>
    %90 = tpu.matmul %87, %89, %cst_84 {dimension_numbers = #tpu.dot_dimension_numbers<[1], [0], [0], [1], [0, 0, 1, 1], [], []>} : vector<128x128xbf16>, vector<128x128xbf16>, vector<128x128xf32> -> vector<128x128xf32>
    %c2_85 = arith.constant 2 : index
    %c0_86 = arith.constant 0 : index
    %c0_87 = arith.constant 0 : index
    %91 = vector.load %arg8[%c2_85, %c0_86, %c0_87] : memref<3x1x128xf32, #tpu.memory_space<vmem>>, vector<1x1x128xf32>
    %92 = vector.shape_cast %91 : vector<1x1x128xf32> to vector<1x128xf32>
    %93 = vector.broadcast %92 : vector<1x128xf32> to vector<128x128xf32>
    %94 = arith.mulf %90, %93 : vector<128x128xf32>
    %c2_88 = arith.constant 2 : index
    %c0_89 = arith.constant 0 : index
    %c0_90 = arith.constant 0 : index
    %95 = vector.load %arg9[%c2_88, %c0_89, %c0_90] : memref<3x1x128xf32, #tpu.memory_space<vmem>>, vector<1x1x128xf32>
    %96 = vector.shape_cast %95 : vector<1x1x128xf32> to vector<1x128xf32>
    %97 = vector.broadcast %96 : vector<1x128xf32> to vector<128x128xf32>
    %98 = arith.addf %94, %97 : vector<128x128xf32>
    %cst_91 = arith.constant 0.000000e+00 : f32
    %99 = vector.broadcast %cst_91 : f32 to vector<128x128xf32>
    %100 = arith.maximumf %98, %99 : vector<128x128xf32>
    %101 = arith.truncf %100 : vector<128x128xf32> to vector<128x128xbf16>
    %c2_92 = arith.constant 2 : index
    %c0_93 = arith.constant 0 : index
    %c0_94 = arith.constant 0 : index
    %102 = vector.load %arg10[%c2_92, %c0_93, %c0_94] : memref<3x128x128xbf16, #tpu.memory_space<vmem>>, vector<1x128x128xbf16>
    %103 = vector.shape_cast %102 : vector<1x128x128xbf16> to vector<128x128xbf16>
    %cst_95 = arith.constant dense<0.000000e+00> : vector<128x128xf32>
    %104 = tpu.matmul %101, %103, %cst_95 {dimension_numbers = #tpu.dot_dimension_numbers<[1], [0], [0], [1], [0, 0, 1, 1], [], []>} : vector<128x128xbf16>, vector<128x128xbf16>, vector<128x128xf32> -> vector<128x128xf32>
    %c2_96 = arith.constant 2 : index
    %c0_97 = arith.constant 0 : index
    %c0_98 = arith.constant 0 : index
    %105 = vector.load %arg11[%c2_96, %c0_97, %c0_98] : memref<3x1x128xf32, #tpu.memory_space<vmem>>, vector<1x1x128xf32>
    %106 = vector.shape_cast %105 : vector<1x1x128xf32> to vector<1x128xf32>
    %107 = vector.broadcast %106 : vector<1x128xf32> to vector<128x128xf32>
    %108 = arith.mulf %104, %107 : vector<128x128xf32>
    %c2_99 = arith.constant 2 : index
    %c0_100 = arith.constant 0 : index
    %c0_101 = arith.constant 0 : index
    %109 = vector.load %arg12[%c2_99, %c0_100, %c0_101] : memref<3x1x128xf32, #tpu.memory_space<vmem>>, vector<1x1x128xf32>
    %110 = vector.shape_cast %109 : vector<1x1x128xf32> to vector<1x128xf32>
    %111 = vector.broadcast %110 : vector<1x128xf32> to vector<128x128xf32>
    %112 = arith.addf %108, %111 : vector<128x128xf32>
    %cst_102 = arith.constant 0.000000e+00 : f32
    %113 = vector.broadcast %cst_102 : f32 to vector<128x128xf32>
    %114 = arith.maximumf %112, %113 : vector<128x128xf32>
    %c0_103 = arith.constant 0 : index
    %c0_104 = arith.constant 0 : index
    %115 = vector.load %arg16[%c0_103, %c0_104] : memref<128x128xf32, #tpu.memory_space<vmem>>, vector<128x128xf32>
    tpu.vector_store %arg16[%c0_103, %c0_104], %114 {strides = array<i32>} : memref<128x128xf32, #tpu.memory_space<vmem>>, vector<128x128xf32>,
    %c0_105 = arith.constant 0 : index
    %c0_106 = arith.constant 0 : index
    %116 = vector.load %arg5[%c0_105, %c0_106] : memref<8x128xbf16, #tpu.memory_space<vmem>>, vector<8x128xbf16>
    %c0_107 = arith.constant 0 : index
    %c0_108 = arith.constant 0 : index
    %117 = vector.load %arg16[%c0_107, %c0_108] : memref<128x128xf32, #tpu.memory_space<vmem>>, vector<128x128xf32>
    %118 = arith.truncf %117 : vector<128x128xf32> to vector<128x128xbf16>
    %cst_109 = arith.constant dense<0.000000e+00> : vector<8x128xf32>
    %119 = tpu.matmul %116, %118, %cst_109 {dimension_numbers = #tpu.dot_dimension_numbers<[1], [0], [0], [1], [0, 0, 1, 1], [], []>} : vector<8x128xbf16>, vector<128x128xbf16>, vector<8x128xf32> -> vector<8x128xf32>
    %c0_110 = arith.constant 0 : index
    %c0_111 = arith.constant 0 : index
    %120 = vector.load %arg6[%c0_110, %c0_111] : memref<8x1xf32, #tpu.memory_space<vmem>>, vector<8x1xf32>
    %121 = vector.broadcast %120 : vector<8x1xf32> to vector<8x128xf32>
    %122 = arith.mulf %119, %121 : vector<8x128xf32>
    %123 = arith.truncf %122 : vector<8x128xf32> to vector<8x128xbf16>
    %c0_112 = arith.constant 0 : index
    %c0_113 = arith.constant 0 : index
    %124 = vector.load %arg13[%c0_112, %c0_113] : memref<128x128xbf16, #tpu.memory_space<vmem>>, vector<128x128xbf16>
    %cst_114 = arith.constant dense<0.000000e+00> : vector<8x128xf32>
    %125 = tpu.matmul %123, %124, %cst_114 {dimension_numbers = #tpu.dot_dimension_numbers<[1], [0], [0], [1], [0, 0, 1, 1], [], []>} : vector<8x128xbf16>, vector<128x128xbf16>, vector<8x128xf32> -> vector<8x128xf32>
    %c0_115 = arith.constant 0 : index
    %c0_116 = arith.constant 0 : index
    %126 = vector.load %arg14[%c0_115, %c0_116] : memref<1x128xf32, #tpu.memory_space<vmem>>, vector<1x128xf32>
    %127 = vector.broadcast %126 : vector<1x128xf32> to vector<8x128xf32>
    %128 = arith.addf %125, %127 : vector<8x128xf32>
    %c0_117 = arith.constant 0 : index
    %c0_118 = arith.constant 0 : index
    %129 = vector.load %arg15[%c0_117, %c0_118] : memref<8x128xf32, #tpu.memory_space<vmem>>, vector<8x128xf32>
    tpu.vector_store %arg15[%c0_117, %c0_118], %128 {strides = array<i32>} : memref<8x128xf32, #tpu.memory_space<vmem>>, vector<8x128xf32>,
    return
  }
}

</mosaic_0001>

<bundles_post_ra>
// kernel: tpu_custom_call.1
= control target key start
LH: loop header
LB: loop body
LE: loop exit
PB: predicated region body
PF: predicated region fallthrough
CT: control target
= control target key end

     0   :  { %20 = vsyncpa [#allocation7], 0  ;;  %s2876_s0 = inlined_call_operand.hbm [shape: f32[3], index: 0, kind: input, shape index: {}]   ;;  %s2877_s1 = inlined_call_operand.hbm [shape: s32[32], index: 1, kind: input, shape index: {}]   ;;  %s2878_s2 = inlined_call_operand.hbm [shape: s32[32], index: 2, kind: input, shape index: {}]   ;;  %s2879_s3 = inlined_call_operand.hbm [shape: f32[128,128], index: 3, kind: input, shape index: {}]   ;;  %s2880_s4 = inlined_call_operand.hbm [shape: f32[32,128], index: 4, kind: input, shape index: {}]   ;;  %s2881_s5 = inlined_call_operand.vmem [shape: bf16[8,128], index: 5, kind: input, shape index: {}]   ;;  %s2882_s6 = inlined_call_operand.vmem [shape: f32[8,1], index: 6, kind: input, shape index: {}]   ;;  %s2883_s7 = inlined_call_operand.hbm [shape: bf16[3,128,128], index: 7, kind: input, shape index: {}]   ;;  %s2884_s8 = inlined_call_operand.vmem [shape: f32[3,1,128], index: 8, kind: input, shape index: {}]   ;;  %s2885_s9 = inlined_call_operand.vmem [shape: f32[3,1,128], index: 9, kind: input, shape index: {}]   ;;  %s2886_s10 = inlined_call_operand.hbm [shape: bf16[3,128,128], index: 10, kind: input, shape index: {}]   ;;  %s2887_s11 = inlined_call_operand.vmem [shape: f32[3,1,128], index: 11, kind: input, shape index: {}]   ;;  %s2888_s12 = inlined_call_operand.vmem [shape: f32[3,1,128], index: 12, kind: input, shape index: {}]   ;;  %s2889_s13 = inlined_call_operand.hbm [shape: bf16[128,128], index: 13, kind: input, shape index: {}]   ;;  %s2890_s14 = inlined_call_operand.vmem [shape: f32[1,128], index: 14, kind: input, shape index: {}]   ;;  %s2891_s15 = inlined_call_operand.hbm [shape: f32[8,128], index: 15, kind: output, shape index: {}]  }
   0x1   :  { %21 = vsyncpa [#allocation9], 0 }
   0x2   :  { %22 = vsyncpa [#allocation5], 0 }
   0x3   :  { %23 = vsyncpa [#allocation13], 0 }
   0x4   :  { %24 = vsyncpa [#allocation16], 0  ;;  %s40_s20 = sshll.u32 %s2877_s1, 4  ;;  %s41_s20 = int_to_ptr.hbm [resolvable:$true] %s40_s20 }
   0x5   :  { %25 = vsyncpa [#allocation6], 0  ;;  %s2367_s21 = smov [#allocation8]   ;;  %s70_s24 = sshll.u32 %s2880_s4, 4  ;;  %s71_s24 = int_to_ptr.hbm [resolvable:$true] %s70_s24 }
   0x6   :  { %43 = dma.hbm_to_smem %s41_s20, 16, %s2367_s21, [#allocation9]  }
   0x7   :  { %s2368_s25 = smov [#allocation12]   ;;  %s2369_s27 = smov 128  }
   0x8   :  { %s72_s26 = sshll.u32 %s2368_s25, 4  ;;  %s2370_s28 = smov 8   ;;  %s73_s26 = int_to_ptr.vmem [resolvable:$true] %s72_s26 }
   0x9   :  { %78 = dma.hbm_to_vmem [thread:$0]  %s71_s24, 512, %s73_s26, [#allocation13], %s2369_s27, %s2369_s27, %s2370_s28  }
   0xa   :  { %s104_s16 = sshll.u32 %s2886_s10, 4  ;;  %s2371_s1 = smov [#allocation15]   ;;  %s105_s16 = int_to_ptr.hbm [resolvable:$true] %s104_s16 }
   0xb   :  { %s106_s17 = sshll.u32 %s2371_s1, 4  ;;  %s31_s20 = sshll.u32 %s2876_s0, 4  ;;  %s107_s17 = int_to_ptr.vmem [resolvable:$true] %s106_s17  ;;  %s32_s20 = int_to_ptr.hbm [resolvable:$true] %s31_s20 }
   0xc   :  { %s2372_s4 = smov 64   ;;  %s2373_s21 = smov 4  }
   0xd   :  { %112 = dma.hbm_to_vmem [thread:$0]  %s105_s16, 3072, %s107_s17, [#allocation16], %s2372_s4, %s2372_s4, %s2373_s21  }
   0xe   :  { %s2374_s22 = smov [#allocation4]   ;;  %s49_s10 = sshll.u32 %s2878_s2, 4  ;;  %s50_s10 = int_to_ptr.hbm [resolvable:$true] %s49_s10 }
   0xf   :  { %34 = dma.hbm_to_smem %s32_s20, 16, %s2374_s22, [#allocation7]  }
  0x10   :  { %s57_s29 = sshll.u32 %s2879_s3, 4  ;;  %s2375_s30 = smov [#allocation10]   ;;  %s58_s29 = int_to_ptr.hbm [resolvable:$true] %s57_s29 }
  0x11   :  { %52 = dma.hbm_to_smem %s50_s10, 16, %s2375_s30, [#allocation9]  }
  0x12   :  { %s2376_s0 = smov [#allocation11]   ;;  %s87_s16 = sshll.u32 %s2883_s7, 4  ;;  %s88_s16 = int_to_ptr.hbm [resolvable:$true] %s87_s16 }
  0x13   :  { %s59_s1 = sshll.u32 %s2376_s0, 4  ;;  %s121_s2 = sshll.u32 %s2889_s13, 4  ;;  %s60_s1 = int_to_ptr.vmem [resolvable:$true] %s59_s1  ;;  %s122_s2 = int_to_ptr.hbm [resolvable:$true] %s121_s2 }
  0x14   :  { %65 = dma.hbm_to_vmem [thread:$0]  %s58_s29, 2048, %s60_s1, [#allocation5], %s2369_s27, %s2369_s27, %s2370_s28  }
  0x15   :  { %s2377_s22 = smov [#allocation14]   ;;  %s2378_s3 = smov [#allocation17]  }
  0x16   :  { %s89_s23 = sshll.u32 %s2377_s22, 4  ;;  %s123_s24 = sshll.u32 %s2378_s3, 4  ;;  %s90_s23 = int_to_ptr.vmem [resolvable:$true] %s89_s23  ;;  %s124_s24 = int_to_ptr.vmem [resolvable:$true] %s123_s24 }
  0x17   :  { %95 = dma.hbm_to_vmem [thread:$0]  %s88_s16, 3072, %s90_s23, [#allocation13], %s2372_s4, %s2372_s4, %s2373_s21  }
  0x18   :  { %129 = dma.hbm_to_vmem [thread:$0]  %s122_s2, 1024, %s124_s24, [#allocation16], %s2372_s4, %s2372_s4, %s2373_s21  }
  0x19   :  { %2343 = dma.done.wait [#allocation7], 16  }
  0x1a   :  { %2344 = vsyncadd [#allocation7], 4294967280 }
  0x1b   :  { %2345 = dma.done.wait [#allocation9], 32  }
  0x1c   :  { %2346 = vsyncadd [#allocation9], 4294967264 }
  0x1d   :  { %2347 = dma.done.wait [#allocation5], 2048  }
  0x1e   :  { %2348 = vsyncadd [#allocation5], 4294965248 }
  0x1f   :  { %2349 = dma.done.wait [#allocation13], 3584  }
  0x20   :  { %2350 = vsyncadd [#allocation13], 4294963712 }
  0x21   :  { %2351 = dma.done.wait [#allocation16], 4096  }
  0x22   :  { %2352 = vsyncadd [#allocation16], 4294963200 }
  0x23   :  { %164 = sfence }
  0x24   :  { %v165_v0 = vld [vmem:[#allocation11] sm:$0xff]  ;;  %v166_v1 = vld [vmem:[#allocation11 + $0x8] sm:$0xff]  ;;  %v167_v2 = vld [vmem:[#allocation11 + $0x10] sm:$0xff]  ;;  %v2379_v16 = vmov 0.0   ;;  %s2355_s7 = smov 0  }
  0x25   :  { %181 = vst [vmem:[#allocation2] sm:$0xff] %v165_v0  ;;  %v168_v3 = vld [vmem:[#allocation11 + $0x18] sm:$0xff]  ;;  %v169_v4 = vld [vmem:[#allocation11 + $0x20] sm:$0xff]  ;;  %v170_v5 = vld [vmem:[#allocation11 + $0x28] sm:$0xff] }
  0x26   :  { %182 = vst [vmem:[#allocation2 + $0x8] sm:$0xff] %v166_v1  ;;  %v171_v6 = vld [vmem:[#allocation11 + $0x30] sm:$0xff]  ;;  %v172_v7 = vld [vmem:[#allocation11 + $0x38] sm:$0xff]  ;;  %v173_v8 = vld [vmem:[#allocation11 + $0x40] sm:$0xff] }
  0x27   :  { %183 = vst [vmem:[#allocation2 + $0x10] sm:$0xff] %v167_v2  ;;  %v174_v9 = vld [vmem:[#allocation11 + $0x48] sm:$0xff]  ;;  %v175_v10 = vld [vmem:[#allocation11 + $0x50] sm:$0xff]  ;;  %v176_v11 = vld [vmem:[#allocation11 + $0x58] sm:$0xff] }
  0x28   :  { %184 = vst [vmem:[#allocation2 + $0x18] sm:$0xff] %v168_v3  ;;  %v177_v12 = vld [vmem:[#allocation11 + $0x60] sm:$0xff]  ;;  %v178_v13 = vld [vmem:[#allocation11 + $0x68] sm:$0xff]  ;;  %v179_v14 = vld [vmem:[#allocation11 + $0x70] sm:$0xff] }
  0x29   :  { %185 = vst [vmem:[#allocation2 + $0x20] sm:$0xff] %v169_v4  ;;  %v180_v15 = vld [vmem:[#allocation11 + $0x78] sm:$0xff] }
  0x2a   :  { %186 = vst [vmem:[#allocation2 + $0x28] sm:$0xff] %v170_v5 }
  0x2b   :  { %187 = vst [vmem:[#allocation2 + $0x30] sm:$0xff] %v171_v6 }
  0x2c   :  { %188 = vst [vmem:[#allocation2 + $0x38] sm:$0xff] %v172_v7 }
  0x2d   :  { %189 = vst [vmem:[#allocation2 + $0x40] sm:$0xff] %v173_v8 }
  0x2e   :  { %190 = vst [vmem:[#allocation2 + $0x48] sm:$0xff] %v174_v9 }
  0x2f   :  { %191 = vst [vmem:[#allocation2 + $0x50] sm:$0xff] %v175_v10 }
  0x30   :  { %192 = vst [vmem:[#allocation2 + $0x58] sm:$0xff] %v176_v11 }
  0x31   :  { %193 = vst [vmem:[#allocation2 + $0x60] sm:$0xff] %v177_v12 }
  0x32   :  { %194 = vst [vmem:[#allocation2 + $0x68] sm:$0xff] %v178_v13 }
  0x33   :  { %195 = vst [vmem:[#allocation2 + $0x70] sm:$0xff] %v179_v14 }
  0x34   :  { %196 = vst [vmem:[#allocation2 + $0x78] sm:$0xff] %v180_v15 }
  0x35   :  { %197 = vst [vmem:[#allocation3] sm:$0xff] %v2379_v16 }
  0x36   :  { %198 = vst [vmem:[#allocation3 + $0x8] sm:$0xff] %v2379_v16 }
  0x37   :  { %199 = vst [vmem:[#allocation3 + $0x10] sm:$0xff] %v2379_v16 }
  0x38   :  { %200 = vst [vmem:[#allocation3 + $0x18] sm:$0xff] %v2379_v16 }
  0x39   :  { %201 = vst [vmem:[#allocation3 + $0x20] sm:$0xff] %v2379_v16 }
  0x3a   :  { %202 = vst [vmem:[#allocation3 + $0x28] sm:$0xff] %v2379_v16 }
  0x3b   :  { %203 = vst [vmem:[#allocation3 + $0x30] sm:$0xff] %v2379_v16 }
  0x3c   :  { %204 = vst [vmem:[#allocation3 + $0x38] sm:$0xff] %v2379_v16 }
  0x3d   :  { %205 = vst [vmem:[#allocation3 + $0x40] sm:$0xff] %v2379_v16 }
  0x3e   :  { %206 = vst [vmem:[#allocation3 + $0x48] sm:$0xff] %v2379_v16 }
  0x3f   :  { %207 = vst [vmem:[#allocation3 + $0x50] sm:$0xff] %v2379_v16 }
  0x40   :  { %208 = vst [vmem:[#allocation3 + $0x58] sm:$0xff] %v2379_v16 }
  0x41   :  { %209 = vst [vmem:[#allocation3 + $0x60] sm:$0xff] %v2379_v16 }
  0x42   :  { %210 = vst [vmem:[#allocation3 + $0x68] sm:$0xff] %v2379_v16 }
  0x43   :  { %211 = vst [vmem:[#allocation3 + $0x70] sm:$0xff] %v2379_v16 }
  0x44   :  { %212 = vst [vmem:[#allocation3 + $0x78] sm:$0xff] %v2379_v16 }
  0x45 LB: > { %s219_s13 = sld [smem:[#allocation8 + %s2357_s7]]  ;;  %s223_s28 = scalar_lea.vmem [#allocation12], %s2357_s7  ;;  %s2357_s7 = sphi %s2355_s7, %s218_s7  }
  0x46   : > { %s220_s27 = sld [smem:[#allocation10 + %s2357_s7]]  ;;  %v224_v17 = vld [vmem:[%s223_s28] sm:$0x1]  ;;  %s218_s7 = sadd.s32 1, %s2357_s7  }
  0x47   : > { %p215_p0 = scmp.ge.s32.totalorder %s218_s7, 32  }
  0x48   :  { %v2033_v23 = vld [vmem:[#allocation14 + $0x38] sm:$0xff] (%p215_p0)  ;;  %v2032_v24 = vld [vmem:[#allocation14 + $0x30] sm:$0xff] (%p215_p0)  ;;  %v2031_v28 = vld [vmem:[#allocation14 + $0x28] sm:$0xff] (%p215_p0)  ;;  %s231_s10 = sld [smem:[#allocation4]] (%p215_p0)  ;;  %s2359_s16 = smov (%p215_p0), 0  }
  0x49   :  { %369 = vmatpush.bf16.msra.mxu0 (%p215_p0), %v2033_v23  ;;  %2082 = vmatpush.bf16.msra.mxu2 (%p215_p0), %v2033_v23  ;;  %v2030_v32 = vld [vmem:[#allocation14 + $0x20] sm:$0xff] (%p215_p0)  ;;  %v2029_v33 = vld [vmem:[#allocation14 + $0x18] sm:$0xff] (%p215_p0)  ;;  %v2028_v34 = vld [vmem:[#allocation14 + $0x10] sm:$0xff] (%p215_p0) }
  0x4a   :  { %v232_v36 = vld [vmem:[#allocation2] sm:$0xff] (%p215_p0)  ;;  %v233_v37 = vld [vmem:[#allocation2 + $0x8] sm:$0xff] (%p215_p0)  ;;  %v242_v40 = vld [vmem:[#allocation2 + $0x50] sm:$0xff] (%p215_p0) }
  0x4b   : > { %s221_s4 = scalar_lea.vmem [#allocation2], %s219_s13  ;;  %v243_v41 = vld [vmem:[#allocation2 + $0x58] sm:$0xff] (%p215_p0)  ;;  %v2027_v48 = vld [vmem:[#allocation14 + $0x8] sm:$0xff] (%p215_p0)  ;;  %v2026_v53 = vld [vmem:[#allocation14] sm:$0xff] (%p215_p0) }
  0x4c   : > { %v222_v18 = vld [vmem:[%s221_s4] sm:$0x1]  ;;  %s227_s21 = scalar_lea.vmem [#allocation3], %s220_s27  ;;  %v234_v57 = vld [vmem:[#allocation2 + $0x10] sm:$0xff] (%p215_p0)  ;;  %v235_v58 = vld [vmem:[#allocation2 + $0x18] sm:$0xff] (%p215_p0) }
  0x4d   : > { %v225_v19 = vadd.f32 %v224_v17, %v222_v18  ;;  %v228_v20 = vld [vmem:[%s227_s21] sm:$0x1]  ;;  %370 = vmatpush.bf16.msra.mxu0 (%p215_p0), %v2032_v24  ;;  %2083 = vmatpush.bf16.msra.mxu2 (%p215_p0), %v2032_v24  ;;  %v245_v61 = vld [vmem:[#allocation2 + $0x68] sm:$0xff] (%p215_p0)  ;;  %v246_v13 = vld [vmem:[#allocation2 + $0x70] sm:$0xff] (%p215_p0) }
  0x4e   :  { %v2522_v39 = vstv (%p215_p0), %s231_s10  ;;  %v244_v60 = vld [vmem:[#allocation2 + $0x60] sm:$0xff] (%p215_p0)  ;;  %v237_v11 = vld [vmem:[#allocation2 + $0x28] sm:$0xff] (%p215_p0)  ;;  %v247_v14 = vld [vmem:[#allocation2 + $0x78] sm:$0xff] (%p215_p0) }
  0x4f   : > { %v226_v21 = vmax.f32 %v225_v19, 0.0  ;;  %217 = sbr.rel (!%p215_p0) target bundleno = 69 (0x45), region = 154  ;;  %v249_v44 = vmul.f32 (%p215_p0), %v2522_v39, %v232_v36  ;;  %v250_v45 = vmul.f32 (%p215_p0), %v2522_v39, %v233_v37  ;;  %v259_v46 = vmul.f32 (%p215_p0), %v2522_v39, %v242_v40  ;;  %v236_v10 = vld [vmem:[#allocation2 + $0x20] sm:$0xff] (%p215_p0)  ;;  %v241_v40 = vld [vmem:[#allocation2 + $0x48] sm:$0xff] (%p215_p0) }
  0x50   :  { %v260_v47 = vmul.f32 (%p215_p0), %v2522_v39, %v243_v41  ;;  %v251_v0 = vmul.f32 (%p215_p0), %v2522_v39, %v234_v57  ;;  %v252_v1 = vmul.f32 (%p215_p0), %v2522_v39, %v235_v58  ;;  %v261_v2 = vmul.f32 (%p215_p0), %v2522_v39, %v244_v60  ;;  %v2038_v36 = vld [vmem:[#allocation15 + $0x20] sm:$0xff] (%p215_p0) }
  0x51   : > { %v229_v22 = vadd.f32 %v228_v20, %v226_v21  ;;  %371 = vmatpush.bf16.msra.mxu0 (%p215_p0), %v2031_v28  ;;  %2084 = vmatpush.bf16.msra.mxu2 (%p215_p0), %v2031_v28  ;;  %v262_v3 = vmul.f32 (%p215_p0), %v2522_v39, %v245_v61  ;;  %v253_v17 = vmul.f32 (%p215_p0), %v2522_v39, %v236_v10  ;;  %v238_v28 = vld [vmem:[#allocation2 + $0x30] sm:$0xff] (%p215_p0) }
  0x52   :  { %v254_v18 = vmul.f32 (%p215_p0), %v2522_v39, %v237_v11  ;;  %v263_v19 = vmul.f32 (%p215_p0), %v2522_v39, %v246_v13  ;;  %v264_v20 = vmul.f32 (%p215_p0), %v2522_v39, %v247_v14 }
  0x53   : > { %230 = vst [vmem:[%s227_s21] sm:$0x1] %v229_v22 }
  0x55   :  { %372 = vmatpush.bf16.msra.mxu0 %v2030_v32  ;;  %2085 = vmatpush.bf16.msra.mxu2 %v2030_v32 }
  0x59   :  { %373 = vmatpush.bf16.msra.mxu0 %v2029_v33  ;;  %2086 = vmatpush.bf16.msra.mxu2 %v2029_v33  ;;  %v2039_v33 = vld [vmem:[#allocation15 + $0x28] sm:$0xff] }
  0x5a   :  { %v265_v25 = vld [vmem:[#allocation3] sm:$0xff]  ;;  %v266_v26 = vld [vmem:[#allocation3 + $0x8] sm:$0xff]  ;;  %v275_v27 = vld [vmem:[#allocation3 + $0x50] sm:$0xff] }
  0x5b   :  { %667 = vst [vmem:[#allocation3] sm:$0xff] %v2379_v16  ;;  %v276_v29 = vld [vmem:[#allocation3 + $0x58] sm:$0xff]  ;;  %v2515_v30 = vld [vmem:[#allocation3 + $0x10] sm:$0xff]  ;;  %v277_v35 = vld [vmem:[#allocation3 + $0x60] sm:$0xff]  ;;  %v281_v49 = vadd.f32 %v265_v25, %v249_v44  ;;  %v282_v50 = vadd.f32 %v266_v26, %v250_v45  ;;  %v291_v51 = vadd.f32 %v275_v27, %v259_v46 }
  0x5c   :  { %668 = vst [vmem:[#allocation3 + $0x8] sm:$0xff] %v2379_v16  ;;  %v2517_v31 = vld [vmem:[#allocation3 + $0x18] sm:$0xff]  ;;  %v278_v38 = vld [vmem:[#allocation3 + $0x68] sm:$0xff]  ;;  %v269_v42 = vld [vmem:[#allocation3 + $0x20] sm:$0xff]  ;;  %v292_v52 = vadd.f32 %v276_v29, %v260_v47  ;;  %v283_v4 = vadd.f32 %v2515_v30, %v251_v0  ;;  %v293_v6 = vadd.f32 %v277_v35, %v261_v2 }
  0x5d   :  { %677 = vst [vmem:[#allocation3 + $0x50] sm:$0xff] %v2379_v16  ;;  %v270_v43 = vld [vmem:[#allocation3 + $0x28] sm:$0xff]  ;;  %374 = vmatpush.bf16.msra.mxu0 %v2028_v34  ;;  %2087 = vmatpush.bf16.msra.mxu2 %v2028_v34  ;;  %v297_v54 = vpack.c.bf16 %v282_v50, %v281_v49  ;;  %v279_v56 = vld [vmem:[#allocation3 + $0x70] sm:$0xff]  ;;  %v280_v59 = vld [vmem:[#allocation3 + $0x78] sm:$0xff]  ;;  %v284_v5 = vadd.f32 %v2517_v31, %v252_v1 }
  0x5e   :  { %678 = vst [vmem:[#allocation3 + $0x58] sm:$0xff] %v2379_v16  ;;  %v302_v55 = vpack.c.bf16 %v292_v52, %v291_v51  ;;  %v271_v62 = vld [vmem:[#allocation3 + $0x30] sm:$0xff]  ;;  %v272_v63 = vld [vmem:[#allocation3 + $0x38] sm:$0xff]  ;;  %v294_v7 = vadd.f32 %v278_v38, %v262_v3  ;;  %v273_v12 = vld [vmem:[#allocation3 + $0x40] sm:$0xff]  ;;  %v285_v21 = vadd.f32 %v269_v42, %v253_v17  ;;  %v286_v22 = vadd.f32 %v270_v43, %v254_v18 }
  0x5f   :  { %669 = vst [vmem:[#allocation3 + $0x10] sm:$0xff] %v2379_v16  ;;  %v298_v8 = vpack.c.bf16 %v284_v5, %v283_v4  ;;  %v274_v15 = vld [vmem:[#allocation3 + $0x48] sm:$0xff]  ;;  %v295_v23 = vadd.f32 %v279_v56, %v263_v19  ;;  %v296_v24 = vadd.f32 %v280_v59, %v264_v20  ;;  %v2041_v27 = vld [vmem:[#allocation15 + $0x38] sm:$0xff]  ;;  %v2040_v30 = vld [vmem:[#allocation15 + $0x30] sm:$0xff]  ;;  %v255_v31 = vmul.f32 %v2522_v39, %v238_v28 }
  0x60   :  { %670 = vst [vmem:[#allocation3 + $0x18] sm:$0xff] %v2379_v16  ;;  %v303_v9 = vpack.c.bf16 %v294_v7, %v293_v6  ;;  %v299_v25 = vpack.c.bf16 %v286_v22, %v285_v21  ;;  %v239_v29 = vld [vmem:[#allocation2 + $0x38] sm:$0xff]  ;;  %546 = vmatpush.bf16.msra.mxu1 %v2041_v27  ;;  %2090 = vmatpush.bf16.msra.mxu3 %v2041_v27  ;;  %v240_v38 = vld [vmem:[#allocation2 + $0x40] sm:$0xff]  ;;  %v2036_v47 = vld [vmem:[#allocation15 + $0x10] sm:$0xff] }
  0x61   :  { %679 = vst [vmem:[#allocation3 + $0x60] sm:$0xff] %v2379_v16  ;;  %375 = vmatpush.bf16.msra.mxu0 %v2027_v48  ;;  %2088 = vmatpush.bf16.msra.mxu2 %v2027_v48  ;;  %v304_v26 = vpack.c.bf16 %v296_v24, %v295_v23  ;;  %v256_v32 = vmul.f32 %v2522_v39, %v239_v29  ;;  %v2037_v46 = vld [vmem:[#allocation15 + $0x18] sm:$0xff]  ;;  %v2035_v48 = vld [vmem:[#allocation15 + $0x8] sm:$0xff]  ;;  %v2034_v49 = vld [vmem:[#allocation15] sm:$0xff] }
  0x62   :  { %680 = vst [vmem:[#allocation3 + $0x68] sm:$0xff] %v2379_v16  ;;  %v287_v34 = vadd.f32 %v271_v62, %v255_v31  ;;  %v257_v41 = vmul.f32 %v2522_v39, %v240_v38  ;;  %v258_v42 = vmul.f32 %v2522_v39, %v241_v40  ;;  %v2554_v39 = vld [vmem:[%s2884_s8] ss:$0 sm:$0xff] }
  0x63   :  { %671 = vst [vmem:[#allocation3 + $0x20] sm:$0xff] %v2379_v16  ;;  %v288_v35 = vadd.f32 %v272_v63, %v256_v32  ;;  %v2560_v52 = vld [vmem:[%s2885_s9] ss:$0 sm:$0xff] }
  0x64   :  { %672 = vst [vmem:[#allocation3 + $0x28] sm:$0xff] %v2379_v16  ;;  %547 = vmatpush.bf16.msra.mxu1 %v2040_v30  ;;  %2091 = vmatpush.bf16.msra.mxu3 %v2040_v30  ;;  %v289_v43 = vadd.f32 %v273_v12, %v257_v41  ;;  %v290_v44 = vadd.f32 %v274_v15, %v258_v42 }
  0x65   :  { %376 = vmatpush.bf16.msra.mxu0 %v2026_v53  ;;  %2089 = vmatpush.bf16.msra.mxu2 %v2026_v53  ;;  %681 = vst [vmem:[#allocation3 + $0x70] sm:$0xff] %v2379_v16  ;;  %v300_v37 = vpack.c.bf16 %v288_v35, %v287_v34 }
  0x66   :  { %682 = vst [vmem:[#allocation3 + $0x78] sm:$0xff] %v2379_v16  ;;  %v301_v45 = vpack.c.bf16 %v290_v44, %v289_v43 }
  0x67   :  { %673 = vst [vmem:[#allocation3 + $0x30] sm:$0xff] %v2379_v16 }
  0x68   :  { %377 = vmatmul.bf16.vlgmr.msra.gmra.mxu0 %v297_v54  ;;  %402 = vmatmul.bf16.vlgmr.msra.gmra.mxu2 %v302_v55  ;;  %674 = vst [vmem:[#allocation3 + $0x38] sm:$0xff] %v2379_v16 }
  0x69   :  { %675 = vst [vmem:[#allocation3 + $0x40] sm:$0xff] %v2379_v16  ;;  %548 = vmatpush.bf16.msra.mxu1 %v2039_v33  ;;  %2092 = vmatpush.bf16.msra.mxu3 %v2039_v33 }
  0x6a   :  { %676 = vst [vmem:[#allocation3 + $0x48] sm:$0xff] %v2379_v16 }
  0x6d   :  { %549 = vmatpush.bf16.msra.mxu1 %v2038_v36  ;;  %2093 = vmatpush.bf16.msra.mxu3 %v2038_v36 }
  0x71   :  { %550 = vmatpush.bf16.msra.mxu1 %v2037_v46  ;;  %2094 = vmatpush.bf16.msra.mxu3 %v2037_v46 }
  0x75   :  { %551 = vmatpush.bf16.msra.mxu1 %v2036_v47  ;;  %2095 = vmatpush.bf16.msra.mxu3 %v2036_v47 }
  0x78   :  { %382 = vmatmul.bf16.gmra.mxu0 %v298_v8  ;;  %407 = vmatmul.bf16.gmra.mxu2 %v303_v9 }
  0x79   :  { %552 = vmatpush.bf16.msra.mxu1 %v2035_v48  ;;  %2096 = vmatpush.bf16.msra.mxu3 %v2035_v48 }
  0x7d   :  { %553 = vmatpush.bf16.msra.mxu1 %v2034_v49  ;;  %2097 = vmatpush.bf16.msra.mxu3 %v2034_v49 }
  0x88   :  { %387 = vmatmul.bf16.gmra.mxu0 %v299_v25  ;;  %412 = vmatmul.bf16.gmra.mxu2 %v304_v26 }
  0x98   :  { %392 = vmatmul.bf16.gmra.mxu0 %v300_v37 }
  0xa8   :  { %397 = vmatmul.bf16.gmra.mxu0 %v301_v45 }
  0xe5   :  { %v378_v50 = vpop.f32.mrf.mxu0 }
  0xe6   :  { %v422_v51 = vmul.f32 %v2554_v39, %v378_v50 }
  0xe8   :  { %v442_v55 = vadd.f32 %v2560_v52, %v422_v51 }
  0xea   :  { %v458_v59 = vmax.f32 %v442_v55, 0.0 }
  0xeb   :  { %v403_v53 = vpop.f32.mrf.mxu2 }
  0xec   :  { %v432_v57 = vmul.f32 %v2554_v39, %v403_v53 }
  0xed   :  { %v380_v54 = vpop.f32.mrf.mxu0 }
  0xee   :  { %v423_v56 = vmul.f32 %v2554_v39, %v380_v54  ;;  %v452_v61 = vadd.f32 %v2560_v52, %v432_v57 }
  0xf0   :  { %v443_v58 = vadd.f32 %v2560_v52, %v423_v56  ;;  %v468_v2 = vmax.f32 %v452_v61, 0.0 }
  0xf2   :  { %v459_v60 = vmax.f32 %v443_v58, 0.0 }
  0xf3   :  { %v405_v62 = vpop.f32.mrf.mxu2 }
  0xf4   :  { %v474_v63 = vpack.c.bf16 %v459_v60, %v458_v59  ;;  %v433_v0 = vmul.f32 %v2554_v39, %v405_v62  ;;  %v2596_v62 = vld [vmem:[%s2887_s11] ss:$0 sm:$0xff] }
  0xf5   :  { %v383_v1 = vpop.f32.mrf.mxu0 }
  0xf6   :  { %554 = vmatmul.bf16.vlgmr.msra.gmra.mxu1 %v474_v63  ;;  %v453_v3 = vadd.f32 %v2560_v52, %v433_v0  ;;  %v424_v5 = vmul.f32 %v2554_v39, %v383_v1  ;;  %v2601_v63 = vld [vmem:[%s2888_s12] ss:$0 sm:$0xff] }
  0xf8   :  { %v469_v4 = vmax.f32 %v453_v3, 0.0  ;;  %v444_v9 = vadd.f32 %v2560_v52, %v424_v5 }
  0xfa   :  { %v479_v6 = vpack.c.bf16 %v469_v4, %v468_v2  ;;  %v460_v13 = vmax.f32 %v444_v9, 0.0 }
  0xfb   :  { %v408_v7 = vpop.f32.mrf.mxu2 }
  0xfc   :  { %579 = vmatmul.bf16.vlgmr.msra.gmra.mxu3 %v479_v6  ;;  %v434_v11 = vmul.f32 %v2554_v39, %v408_v7 }
  0xfd   :  { %v385_v8 = vpop.f32.mrf.mxu0 }
  0xfe   :  { %v425_v10 = vmul.f32 %v2554_v39, %v385_v8  ;;  %v454_v15 = vadd.f32 %v2560_v52, %v434_v11 }
 0x100   :  { %v445_v12 = vadd.f32 %v2560_v52, %v425_v10  ;;  %v470_v21 = vmax.f32 %v454_v15, 0.0 }
 0x102   :  { %v461_v14 = vmax.f32 %v445_v12, 0.0 }
 0x103   :  { %v410_v17 = vpop.f32.mrf.mxu2 }
 0x104   :  { %v475_v18 = vpack.c.bf16 %v461_v14, %v460_v13  ;;  %v435_v19 = vmul.f32 %v2554_v39, %v410_v17 }
 0x105   :  { %v388_v20 = vpop.f32.mrf.mxu0 }
 0x106   :  { %559 = vmatmul.bf16.gmra.mxu1 %v475_v18  ;;  %v455_v22 = vadd.f32 %v2560_v52, %v435_v19  ;;  %v426_v24 = vmul.f32 %v2554_v39, %v388_v20 }
 0x108   :  { %v471_v23 = vmax.f32 %v455_v22, 0.0  ;;  %v446_v28 = vadd.f32 %v2560_v52, %v426_v24 }
 0x10a   :  { %v480_v25 = vpack.c.bf16 %v471_v23, %v470_v21  ;;  %v462_v32 = vmax.f32 %v446_v28, 0.0 }
 0x10b   :  { %v413_v26 = vpop.f32.mrf.mxu2 }
 0x10c   :  { %584 = vmatmul.bf16.gmra.mxu3 %v480_v25  ;;  %v436_v30 = vmul.f32 %v2554_v39, %v413_v26 }
 0x10d   :  { %v390_v27 = vpop.f32.mrf.mxu0 }
 0x10e   :  { %v427_v29 = vmul.f32 %v2554_v39, %v390_v27  ;;  %v456_v34 = vadd.f32 %v2560_v52, %v436_v30 }
 0x110   :  { %v447_v31 = vadd.f32 %v2560_v52, %v427_v29  ;;  %v472_v40 = vmax.f32 %v456_v34, 0.0 }
 0x112   :  { %v463_v33 = vmax.f32 %v447_v31, 0.0 }
 0x113   :  { %v415_v35 = vpop.f32.mrf.mxu2 }
 0x114   :  { %v476_v36 = vpack.c.bf16 %v463_v33, %v462_v32  ;;  %v437_v37 = vmul.f32 %v2554_v39, %v415_v35 }
 0x115   :  { %v393_v38 = vpop.f32.mrf.mxu0 }
 0x116   :  { %564 = vmatmul.bf16.gmra.mxu1 %v476_v36  ;;  %v457_v41 = vadd.f32 %v2560_v52, %v437_v37  ;;  %v428_v43 = vmul.f32 %v2554_v39, %v393_v38 }
 0x118   :  { %v473_v42 = vmax.f32 %v457_v41, 0.0  ;;  %v448_v46 = vadd.f32 %v2560_v52, %v428_v43 }
 0x11a   :  { %v481_v44 = vpack.c.bf16 %v473_v42, %v472_v40  ;;  %v464_v49 = vmax.f32 %v448_v46, 0.0 }
 0x11c   :  { %589 = vmatmul.bf16.gmra.mxu3 %v481_v44 }
 0x11d   :  { %v395_v45 = vpop.f32.mrf.mxu0 }
 0x11e   :  { %v429_v47 = vmul.f32 %v2554_v39, %v395_v45 }
 0x120   :  { %v449_v48 = vadd.f32 %v2560_v52, %v429_v47 }
 0x122   :  { %v465_v50 = vmax.f32 %v449_v48, 0.0 }
 0x124   :  { %v477_v51 = vpack.c.bf16 %v465_v50, %v464_v49 }
 0x125   :  { %v398_v53 = vpop.f32.mrf.mxu0 }
 0x126   :  { %v430_v54 = vmul.f32 %v2554_v39, %v398_v53  ;;  %569 = vmatmul.bf16.gmra.mxu1 %v477_v51 }
 0x128   :  { %v450_v55 = vadd.f32 %v2560_v52, %v430_v54 }
 0x12a   :  { %v466_v59 = vmax.f32 %v450_v55, 0.0 }
 0x12d   :  { %v400_v56 = vpop.f32.mrf.mxu0 }
 0x12e   :  { %v431_v57 = vmul.f32 %v2554_v39, %v400_v56 }
 0x130   :  { %v451_v58 = vadd.f32 %v2560_v52, %v431_v57 }
 0x132   :  { %v467_v60 = vmax.f32 %v451_v58, 0.0 }
 0x134   :  { %v478_v61 = vpack.c.bf16 %v467_v60, %v466_v59 }
 0x136   :  { %574 = vmatmul.bf16.gmra.mxu1 %v478_v61 }
 0x173   :  { %v555_v0 = vpop.f32.mrf.mxu1 }
 0x174   :  { %v599_v1 = vmul.f32 %v2596_v62, %v555_v0 }
 0x176   :  { %v619_v39 = vadd.f32 %v2601_v63, %v599_v1 }
 0x178   :  { %v635_v52 = vmax.f32 %v619_v39, 0.0 }
 0x17a   :  { %651 = vst [vmem:[#allocation2] sm:$0xff] %v635_v52 }
 0x17b   :  { %v557_v2 = vpop.f32.mrf.mxu1 }
 0x17c   :  { %v600_v3 = vmul.f32 %v2596_v62, %v557_v2 }
 0x17e   :  { %v620_v4 = vadd.f32 %v2601_v63, %v600_v3 }
 0x17f   :  { %v580_v5 = vpop.f32.mrf.mxu3 }
 0x180   :  { %v636_v6 = vmax.f32 %v620_v4, 0.0  ;;  %v609_v7 = vmul.f32 %v2596_v62, %v580_v5 }
 0x182   :  { %652 = vst [vmem:[#allocation2 + $0x8] sm:$0xff] %v636_v6  ;;  %v629_v8 = vadd.f32 %v2601_v63, %v609_v7 }
 0x183   :  { %v560_v9 = vpop.f32.mrf.mxu1 }
 0x184   :  { %v601_v10 = vmul.f32 %v2596_v62, %v560_v9  ;;  %v645_v11 = vmax.f32 %v629_v8, 0.0 }
 0x186   :  { %v621_v12 = vadd.f32 %v2601_v63, %v601_v10  ;;  %661 = vst [vmem:[#allocation2 + $0x50] sm:$0xff] %v645_v11 }
 0x187   :  { %v582_v13 = vpop.f32.mrf.mxu3 }
 0x188   :  { %v637_v14 = vmax.f32 %v621_v12, 0.0  ;;  %v610_v15 = vmul.f32 %v2596_v62, %v582_v13 }
 0x18a   :  { %653 = vst [vmem:[#allocation2 + $0x10] sm:$0xff] %v637_v14  ;;  %v630_v17 = vadd.f32 %v2601_v63, %v610_v15 }
 0x18b   :  { %v562_v18 = vpop.f32.mrf.mxu1 }
 0x18c   :  { %v602_v19 = vmul.f32 %v2596_v62, %v562_v18  ;;  %v646_v20 = vmax.f32 %v630_v17, 0.0 }
 0x18e   :  { %v622_v21 = vadd.f32 %v2601_v63, %v602_v19  ;;  %662 = vst [vmem:[#allocation2 + $0x58] sm:$0xff] %v646_v20 }
 0x18f   :  { %v585_v22 = vpop.f32.mrf.mxu3 }
 0x190   :  { %v638_v23 = vmax.f32 %v622_v21, 0.0  ;;  %v611_v24 = vmul.f32 %v2596_v62, %v585_v22 }
 0x192   :  { %654 = vst [vmem:[#allocation2 + $0x18] sm:$0xff] %v638_v23  ;;  %v631_v25 = vadd.f32 %v2601_v63, %v611_v24 }
 0x193   :  { %v565_v26 = vpop.f32.mrf.mxu1 }
 0x194   :  { %v603_v27 = vmul.f32 %v2596_v62, %v565_v26  ;;  %v647_v28 = vmax.f32 %v631_v25, 0.0 }
 0x196   :  { %v623_v29 = vadd.f32 %v2601_v63, %v603_v27  ;;  %663 = vst [vmem:[#allocation2 + $0x60] sm:$0xff] %v647_v28 }
 0x197   :  { %v587_v30 = vpop.f32.mrf.mxu3 }
 0x198   :  { %v639_v31 = vmax.f32 %v623_v29, 0.0  ;;  %v612_v32 = vmul.f32 %v2596_v62, %v587_v30 }
 0x19a   :  { %655 = vst [vmem:[#allocation2 + $0x20] sm:$0xff] %v639_v31  ;;  %v632_v33 = vadd.f32 %v2601_v63, %v612_v32 }
 0x19b   :  { %v567_v34 = vpop.f32.mrf.mxu1 }
 0x19c   :  { %v604_v35 = vmul.f32 %v2596_v62, %v567_v34  ;;  %v648_v36 = vmax.f32 %v632_v33, 0.0 }
 0x19e   :  { %v624_v37 = vadd.f32 %v2601_v63, %v604_v35  ;;  %664 = vst [vmem:[#allocation2 + $0x68] sm:$0xff] %v648_v36 }
 0x19f   :  { %v590_v38 = vpop.f32.mrf.mxu3 }
 0x1a0   :  { %v640_v40 = vmax.f32 %v624_v37, 0.0  ;;  %v613_v41 = vmul.f32 %v2596_v62, %v590_v38 }
 0x1a2   :  { %656 = vst [vmem:[#allocation2 + $0x28] sm:$0xff] %v640_v40  ;;  %v633_v42 = vadd.f32 %v2601_v63, %v613_v41 }
 0x1a3   :  { %v570_v43 = vpop.f32.mrf.mxu1 }
 0x1a4   :  { %v605_v44 = vmul.f32 %v2596_v62, %v570_v43  ;;  %v649_v45 = vmax.f32 %v633_v42, 0.0 }
 0x1a6   :  { %v625_v46 = vadd.f32 %v2601_v63, %v605_v44  ;;  %665 = vst [vmem:[#allocation2 + $0x70] sm:$0xff] %v649_v45 }
 0x1a7   :  { %v592_v47 = vpop.f32.mrf.mxu3 }
 0x1a8   :  { %v641_v48 = vmax.f32 %v625_v46, 0.0  ;;  %v614_v49 = vmul.f32 %v2596_v62, %v592_v47 }
 0x1aa   :  { %657 = vst [vmem:[#allocation2 + $0x30] sm:$0xff] %v641_v48  ;;  %v634_v50 = vadd.f32 %v2601_v63, %v614_v49 }
 0x1ab   :  { %v572_v51 = vpop.f32.mrf.mxu1 }
 0x1ac   :  { %v606_v53 = vmul.f32 %v2596_v62, %v572_v51  ;;  %v650_v54 = vmax.f32 %v634_v50, 0.0 }
 0x1ae   :  { %v626_v55 = vadd.f32 %v2601_v63, %v606_v53  ;;  %666 = vst [vmem:[#allocation2 + $0x78] sm:$0xff] %v650_v54 }
 0x1b0   :  { %v642_v56 = vmax.f32 %v626_v55, 0.0 }
 0x1b2   :  { %658 = vst [vmem:[#allocation2 + $0x38] sm:$0xff] %v642_v56 }
 0x1b3   :  { %v575_v57 = vpop.f32.mrf.mxu1 }
 0x1b4   :  { %v607_v58 = vmul.f32 %v2596_v62, %v575_v57 }
 0x1b6   :  { %v627_v59 = vadd.f32 %v2601_v63, %v607_v58 }
 0x1b8   :  { %v643_v60 = vmax.f32 %v627_v59, 0.0 }
 0x1ba   :  { %659 = vst [vmem:[#allocation2 + $0x40] sm:$0xff] %v643_v60 }
 0x1bb   :  { %v577_v61 = vpop.f32.mrf.mxu1 }
 0x1bc   :  { %v608_v0 = vmul.f32 %v2596_v62, %v577_v61 }
 0x1be   :  { %v628_v1 = vadd.f32 %v2601_v63, %v608_v0 }
 0x1c0   :  { %v644_v39 = vmax.f32 %v628_v1, 0.0 }
 0x1c2   :  { %660 = vst [vmem:[#allocation2 + $0x48] sm:$0xff] %v644_v39 }
 0x1c3 LB: > { %s689_s17 = sld [smem:[#allocation8 + %s2361_s16]]  ;;  %s693_s2 = scalar_lea.vmem [#allocation12], %s2361_s16  ;;  %s2361_s16 = sphi %s2359_s16, %s688_s16  }
 0x1c4   : > { %s690_s20 = sld [smem:[#allocation10 + %s2361_s16]]  ;;  %v694_v52 = vld [vmem:[%s693_s2] sm:$0x1]  ;;  %s688_s16 = sadd.s32 1, %s2361_s16  }
 0x1c5   : > { %p685_p1 = scmp.ge.s32.totalorder %s688_s16, 32  }
 0x1c6   :  { %v2049_v62 = vld [vmem:[#allocation14 + $0x78] sm:$0xff] (%p685_p1)  ;;  %v2048_v63 = vld [vmem:[#allocation14 + $0x70] sm:$0xff] (%p685_p1)  ;;  %v2047_v8 = vld [vmem:[#allocation14 + $0x68] sm:$0xff] (%p685_p1)  ;;  %s1856_s3 = sld [smem:[#allocation4 + $0x1]] (%p685_p1)  ;;  %s2363_s25 = smov (%p685_p1), 0  }
 0x1c7   :  { %840 = vmatpush.bf16.msrb.mxu2 (%p685_p1), %v2049_v62  ;;  %v2046_v12 = vld [vmem:[#allocation14 + $0x60] sm:$0xff] (%p685_p1)  ;;  %v2045_v13 = vld [vmem:[#allocation14 + $0x58] sm:$0xff] (%p685_p1)  ;;  %v2044_v14 = vld [vmem:[#allocation14 + $0x50] sm:$0xff] (%p685_p1) }
 0x1c8   :  { %v702_v17 = vld [vmem:[#allocation2] sm:$0xff] (%p685_p1)  ;;  %v703_v18 = vld [vmem:[#allocation2 + $0x8] sm:$0xff] (%p685_p1)  ;;  %v704_v29 = vld [vmem:[#allocation2 + $0x10] sm:$0xff] (%p685_p1) }
 0x1c9   : > { %s691_s22 = scalar_lea.vmem [#allocation2], %s689_s17  ;;  %v2043_v23 = vld [vmem:[#allocation14 + $0x48] sm:$0xff] (%p685_p1)  ;;  %v2042_v26 = vld [vmem:[#allocation14 + $0x40] sm:$0xff] (%p685_p1)  ;;  %v705_v30 = vld [vmem:[#allocation2 + $0x18] sm:$0xff] (%p685_p1) }
 0x1ca   : > { %v692_v2 = vld [vmem:[%s691_s22] sm:$0x1]  ;;  %s697_s23 = scalar_lea.vmem [#allocation3], %s690_s20  ;;  %v707_v40 = vld [vmem:[#allocation2 + $0x28] sm:$0xff] (%p685_p1)  ;;  %v708_v48 = vld [vmem:[#allocation2 + $0x30] sm:$0xff] (%p685_p1) }
 0x1cb   : > { %v695_v3 = vadd.f32 %v694_v52, %v692_v2  ;;  %v698_v4 = vld [vmem:[%s697_s23] sm:$0x1]  ;;  %841 = vmatpush.bf16.msrb.mxu2 (%p685_p1), %v2048_v63  ;;  %v709_v49 = vld [vmem:[#allocation2 + $0x38] sm:$0xff] (%p685_p1)  ;;  %v711_v59 = vld [vmem:[#allocation2 + $0x48] sm:$0xff] (%p685_p1) }
 0x1cc   :  { %v2639_v19 = vstv (%p685_p1), %s1856_s3  ;;  %v706_v38 = vld [vmem:[#allocation2 + $0x20] sm:$0xff] (%p685_p1) }
 0x1cd   : > { %v696_v5 = vmax.f32 %v695_v3, 0.0  ;;  %687 = sbr.rel (!%p685_p1) target bundleno = 451 (0x1c3), region = 165  ;;  %v719_v21 = vmul.f32 (%p685_p1), %v2639_v19, %v702_v17  ;;  %v720_v22 = vmul.f32 (%p685_p1), %v2639_v19, %v703_v18  ;;  %v721_v32 = vmul.f32 (%p685_p1), %v2639_v19, %v704_v29  ;;  %v710_v58 = vld [vmem:[#allocation2 + $0x40] sm:$0xff] (%p685_p1)  ;;  %v712_v3 = vld [vmem:[#allocation2 + $0x50] sm:$0xff] (%p685_p1)  ;;  %v2051_v29 = vld [vmem:[#allocation15 + $0x48] sm:$0xff] (%p685_p1) }
 0x1ce   :  { %v722_v33 = vmul.f32 (%p685_p1), %v2639_v19, %v705_v30  ;;  %v723_v42 = vmul.f32 (%p685_p1), %v2639_v19, %v706_v38  ;;  %v724_v43 = vmul.f32 (%p685_p1), %v2639_v19, %v707_v40  ;;  %v725_v51 = vmul.f32 (%p685_p1), %v2639_v19, %v708_v48  ;;  %v2054_v18 = vld [vmem:[#allocation15 + $0x60] sm:$0xff] (%p685_p1) }
 0x1cf   : > { %v699_v6 = vadd.f32 %v698_v4, %v696_v5  ;;  %842 = vmatpush.bf16.msrb.mxu2 (%p685_p1), %v2047_v8  ;;  %v726_v53 = vmul.f32 (%p685_p1), %v2639_v19, %v709_v49  ;;  %v727_v61 = vmul.f32 (%p685_p1), %v2639_v19, %v710_v58  ;;  %v728_v0 = vmul.f32 (%p685_p1), %v2639_v19, %v711_v59  ;;  %v713_v4 = vld [vmem:[#allocation2 + $0x58] sm:$0xff] (%p685_p1) }
 0x1d0   :  { %v730_v62 = vmul.f32 (%p685_p1), %v2639_v19, %v713_v4 }
 0x1d1   : > { %700 = vst [vmem:[%s697_s23] sm:$0x1] %v699_v6  ;;  %v729_v6 = vmul.f32 (%p685_p1), %v2639_v19, %v712_v3 }
 0x1d3   :  { %843 = vmatpush.bf16.msrb.mxu2 %v2046_v12  ;;  %v2056_v12 = vld [vmem:[#allocation15 + $0x70] sm:$0xff] }
 0x1d7   :  { %844 = vmatpush.bf16.msrb.mxu2 %v2045_v13 }
 0x1d8   :  { %v735_v7 = vld [vmem:[#allocation3] sm:$0xff]  ;;  %v736_v9 = vld [vmem:[#allocation3 + $0x8] sm:$0xff]  ;;  %v737_v10 = vld [vmem:[#allocation3 + $0x10] sm:$0xff] }
 0x1d9   :  { %1143 = vst [vmem:[#allocation3] sm:$0xff] %v2379_v16  ;;  %v738_v11 = vld [vmem:[#allocation3 + $0x18] sm:$0xff]  ;;  %v739_v15 = vld [vmem:[#allocation3 + $0x20] sm:$0xff]  ;;  %v740_v20 = vld [vmem:[#allocation3 + $0x28] sm:$0xff]  ;;  %v751_v24 = vadd.f32 %v735_v7, %v719_v21  ;;  %v752_v25 = vadd.f32 %v736_v9, %v720_v22  ;;  %v753_v34 = vadd.f32 %v737_v10, %v721_v32 }
 0x1da   :  { %1144 = vst [vmem:[#allocation3 + $0x8] sm:$0xff] %v2379_v16  ;;  %v741_v28 = vld [vmem:[#allocation3 + $0x30] sm:$0xff]  ;;  %v742_v31 = vld [vmem:[#allocation3 + $0x38] sm:$0xff]  ;;  %v754_v35 = vadd.f32 %v738_v11, %v722_v33  ;;  %v743_v37 = vld [vmem:[#allocation3 + $0x40] sm:$0xff]  ;;  %v755_v44 = vadd.f32 %v739_v15, %v723_v42  ;;  %v756_v45 = vadd.f32 %v740_v20, %v724_v43 }
 0x1db   :  { %1145 = vst [vmem:[#allocation3 + $0x10] sm:$0xff] %v2379_v16  ;;  %845 = vmatpush.bf16.msrb.mxu2 %v2044_v14  ;;  %v767_v27 = vpack.c.bf16 %v752_v25, %v751_v24  ;;  %v744_v41 = vld [vmem:[#allocation3 + $0x48] sm:$0xff]  ;;  %v745_v47 = vld [vmem:[#allocation3 + $0x50] sm:$0xff]  ;;  %v746_v50 = vld [vmem:[#allocation3 + $0x58] sm:$0xff]  ;;  %v757_v54 = vadd.f32 %v741_v28, %v725_v51  ;;  %v758_v55 = vadd.f32 %v742_v31, %v726_v53 }
 0x1dc   :  { %1146 = vst [vmem:[#allocation3 + $0x18] sm:$0xff] %v2379_v16  ;;  %v768_v36 = vpack.c.bf16 %v754_v35, %v753_v34  ;;  %v769_v46 = vpack.c.bf16 %v756_v45, %v755_v44  ;;  %v747_v57 = vld [vmem:[#allocation3 + $0x60] sm:$0xff]  ;;  %v748_v60 = vld [vmem:[#allocation3 + $0x68] sm:$0xff]  ;;  %v759_v1 = vadd.f32 %v743_v37, %v727_v61  ;;  %v760_v39 = vadd.f32 %v744_v41, %v728_v0  ;;  %v749_v2 = vld [vmem:[#allocation3 + $0x70] sm:$0xff] }
 0x1dd   :  { %1147 = vst [vmem:[#allocation3 + $0x20] sm:$0xff] %v2379_v16  ;;  %v770_v56 = vpack.c.bf16 %v758_v55, %v757_v54  ;;  %v750_v5 = vld [vmem:[#allocation3 + $0x78] sm:$0xff]  ;;  %v761_v63 = vadd.f32 %v745_v47, %v729_v6  ;;  %v762_v7 = vadd.f32 %v746_v50, %v730_v62  ;;  %v714_v10 = vld [vmem:[#allocation2 + $0x60] sm:$0xff]  ;;  %v715_v11 = vld [vmem:[#allocation2 + $0x68] sm:$0xff] }
 0x1de   :  { %1148 = vst [vmem:[#allocation3 + $0x28] sm:$0xff] %v2379_v16  ;;  %v771_v52 = vpack.c.bf16 %v760_v39, %v759_v1  ;;  %v2057_v9 = vld [vmem:[#allocation15 + $0x78] sm:$0xff]  ;;  %v731_v13 = vmul.f32 %v2639_v19, %v714_v10  ;;  %v732_v14 = vmul.f32 %v2639_v19, %v715_v11  ;;  %v2055_v15 = vld [vmem:[#allocation15 + $0x68] sm:$0xff]  ;;  %v716_v21 = vld [vmem:[#allocation2 + $0x70] sm:$0xff] }
 0x1df   :  { %846 = vmatpush.bf16.msrb.mxu2 %v2043_v23  ;;  %1149 = vst [vmem:[#allocation3 + $0x30] sm:$0xff] %v2379_v16  ;;  %v772_v8 = vpack.c.bf16 %v762_v7, %v761_v63  ;;  %1020 = vmatpush.bf16.msrb.mxu3 %v2057_v9  ;;  %v717_v22 = vld [vmem:[#allocation2 + $0x78] sm:$0xff]  ;;  %v733_v24 = vmul.f32 %v2639_v19, %v716_v21  ;;  %v2050_v31 = vld [vmem:[#allocation15 + $0x40] sm:$0xff] }
 0x1e0   :  { %1150 = vst [vmem:[#allocation3 + $0x38] sm:$0xff] %v2379_v16  ;;  %v764_v17 = vadd.f32 %v748_v60, %v732_v14  ;;  %v2053_v23 = vld [vmem:[#allocation15 + $0x58] sm:$0xff]  ;;  %v734_v25 = vmul.f32 %v2639_v19, %v717_v22  ;;  %v2672_v33 = vld [vmem:[%s2884_s8 + $0x1] ss:$0 sm:$0xff] }
 0x1e1   :  { %1151 = vst [vmem:[#allocation3 + $0x40] sm:$0xff] %v2379_v16  ;;  %v2678_v19 = vld [vmem:[%s2885_s9 + $0x1] ss:$0 sm:$0xff] }
 0x1e2   :  { %1152 = vst [vmem:[#allocation3 + $0x48] sm:$0xff] %v2379_v16  ;;  %v766_v28 = vadd.f32 %v750_v5, %v734_v25 }
 0x1e3   :  { %847 = vmatpush.bf16.msrb.mxu2 %v2042_v26  ;;  %1153 = vst [vmem:[#allocation3 + $0x50] sm:$0xff] %v2379_v16  ;;  %1021 = vmatpush.bf16.msrb.mxu3 %v2056_v12  ;;  %v2052_v26 = vld [vmem:[#allocation15 + $0x50] sm:$0xff] }
 0x1e4   :  { %1154 = vst [vmem:[#allocation3 + $0x58] sm:$0xff] %v2379_v16 }
 0x1e5   :  { %1155 = vst [vmem:[#allocation3 + $0x60] sm:$0xff] %v2379_v16 }
 0x1e6   :  { %848 = vmatmul.bf16.vlgmr.msrb.gmra.mxu2 %v767_v27  ;;  %1156 = vst [vmem:[#allocation3 + $0x68] sm:$0xff] %v2379_v16  ;;  %v765_v27 = vadd.f32 %v749_v2, %v733_v24 }
 0x1e7   :  { %1157 = vst [vmem:[#allocation3 + $0x70] sm:$0xff] %v2379_v16  ;;  %1022 = vmatpush.bf16.msrb.mxu3 %v2055_v15 }
 0x1e8   :  { %1158 = vst [vmem:[#allocation3 + $0x78] sm:$0xff] %v2379_v16  ;;  %v763_v16 = vadd.f32 %v747_v57, %v731_v13  ;;  %v774_v30 = vpack.c.bf16 %v766_v28, %v765_v27 }
 0x1ea   :  { %v773_v20 = vpack.c.bf16 %v764_v17, %v763_v16 }
 0x1eb   :  { %1023 = vmatpush.bf16.msrb.mxu3 %v2054_v18 }
 0x1ef   :  { %1024 = vmatpush.bf16.msrb.mxu3 %v2053_v23 }
 0x1f3   :  { %1025 = vmatpush.bf16.msrb.mxu3 %v2052_v26 }
 0x1f6   :  { %853 = vmatmul.bf16.gmra.mxu2 %v768_v36 }
 0x1f7   :  { %1026 = vmatpush.bf16.msrb.mxu3 %v2051_v29 }
 0x1fb   :  { %1027 = vmatpush.bf16.msrb.mxu3 %v2050_v31 }
 0x206   :  { %858 = vmatmul.bf16.gmra.mxu2 %v769_v46 }
 0x216   :  { %863 = vmatmul.bf16.gmra.mxu2 %v770_v56 }
 0x226   :  { %868 = vmatmul.bf16.gmra.mxu2 %v771_v52 }
 0x236   :  { %873 = vmatmul.bf16.gmra.mxu2 %v772_v8 }
 0x246   :  { %878 = vmatmul.bf16.gmra.mxu2 %v773_v20 }
 0x256   :  { %883 = vmatmul.bf16.gmra.mxu2 %v774_v30 }
 0x269   :  { %v849_v32 = vpop.f32.mrf.mxu2 }
 0x26a   :  { %v894_v34 = vmul.f32 %v2672_v33, %v849_v32 }
 0x26c   :  { %v915_v36 = vadd.f32 %v2678_v19, %v894_v34 }
 0x26e   :  { %v931_v40 = vmax.f32 %v915_v36, 0.0 }
 0x271   :  { %v851_v35 = vpop.f32.mrf.mxu2 }
 0x272   :  { %v895_v37 = vmul.f32 %v2672_v33, %v851_v35 }
 0x274   :  { %v916_v38 = vadd.f32 %v2678_v19, %v895_v37 }
 0x276   :  { %v932_v41 = vmax.f32 %v916_v38, 0.0 }
 0x278   :  { %v947_v42 = vpack.c.bf16 %v932_v41, %v931_v40 }
 0x279   :  { %v854_v43 = vpop.f32.mrf.mxu2 }
 0x27a   :  { %1028 = vmatmul.bf16.vlgmr.msrb.gmra.mxu3 %v947_v42  ;;  %v896_v44 = vmul.f32 %v2672_v33, %v854_v43 }
 0x27c   :  { %v917_v46 = vadd.f32 %v2678_v19, %v896_v44  ;;  %v2714_v44 = vld [vmem:[%s2887_s11 + $0x1] ss:$0 sm:$0xff] }
 0x27e   :  { %v933_v49 = vmax.f32 %v917_v46, 0.0 }
 0x281   :  { %v856_v45 = vpop.f32.mrf.mxu2 }
 0x282   :  { %v897_v47 = vmul.f32 %v2672_v33, %v856_v45  ;;  %v2719_v45 = vld [vmem:[%s2888_s12 + $0x1] ss:$0 sm:$0xff] }
 0x284   :  { %v918_v48 = vadd.f32 %v2678_v19, %v897_v47 }
 0x286   :  { %v934_v50 = vmax.f32 %v918_v48, 0.0 }
 0x288   :  { %v948_v51 = vpack.c.bf16 %v934_v50, %v933_v49 }
 0x289   :  { %v859_v53 = vpop.f32.mrf.mxu2 }
 0x28a   :  { %1033 = vmatmul.bf16.gmra.mxu3 %v948_v51  ;;  %v898_v54 = vmul.f32 %v2672_v33, %v859_v53 }
 0x28c   :  { %v919_v56 = vadd.f32 %v2678_v19, %v898_v54 }
 0x28e   :  { %v935_v59 = vmax.f32 %v919_v56, 0.0 }
 0x291   :  { %v861_v55 = vpop.f32.mrf.mxu2 }
 0x292   :  { %v899_v57 = vmul.f32 %v2672_v33, %v861_v55 }
 0x294   :  { %v920_v58 = vadd.f32 %v2678_v19, %v899_v57 }
 0x296   :  { %v936_v60 = vmax.f32 %v920_v58, 0.0 }
 0x298   :  { %v949_v61 = vpack.c.bf16 %v936_v60, %v935_v59 }
 0x299   :  { %v864_v0 = vpop.f32.mrf.mxu2 }
 0x29a   :  { %1038 = vmatmul.bf16.gmra.mxu3 %v949_v61  ;;  %v900_v1 = vmul.f32 %v2672_v33, %v864_v0 }
 0x29c   :  { %v921_v52 = vadd.f32 %v2678_v19, %v900_v1 }
 0x29e   :  { %v937_v4 = vmax.f32 %v921_v52, 0.0 }
 0x2a1   :  { %v866_v39 = vpop.f32.mrf.mxu2 }
 0x2a2   :  { %v901_v2 = vmul.f32 %v2672_v33, %v866_v39 }
 0x2a4   :  { %v922_v3 = vadd.f32 %v2678_v19, %v901_v2 }
 0x2a6   :  { %v938_v5 = vmax.f32 %v922_v3, 0.0 }
 0x2a8   :  { %v950_v6 = vpack.c.bf16 %v938_v5, %v937_v4 }
 0x2a9   :  { %v869_v62 = vpop.f32.mrf.mxu2 }
 0x2aa   :  { %1043 = vmatmul.bf16.gmra.mxu3 %v950_v6  ;;  %v902_v63 = vmul.f32 %v2672_v33, %v869_v62 }
 0x2ac   :  { %v923_v8 = vadd.f32 %v2678_v19, %v902_v63 }
 0x2ae   :  { %v939_v11 = vmax.f32 %v923_v8, 0.0 }
 0x2b1   :  { %v871_v7 = vpop.f32.mrf.mxu2 }
 0x2b2   :  { %v903_v9 = vmul.f32 %v2672_v33, %v871_v7 }
 0x2b4   :  { %v924_v10 = vadd.f32 %v2678_v19, %v903_v9 }
 0x2b6   :  { %v940_v12 = vmax.f32 %v924_v10, 0.0 }
 0x2b8   :  { %v951_v13 = vpack.c.bf16 %v940_v12, %v939_v11 }
 0x2b9   :  { %v874_v14 = vpop.f32.mrf.mxu2 }
 0x2ba   :  { %1048 = vmatmul.bf16.gmra.mxu3 %v951_v13  ;;  %v904_v15 = vmul.f32 %v2672_v33, %v874_v14 }
 0x2bc   :  { %v925_v17 = vadd.f32 %v2678_v19, %v904_v15 }
 0x2be   :  { %v941_v21 = vmax.f32 %v925_v17, 0.0 }
 0x2c1   :  { %v876_v16 = vpop.f32.mrf.mxu2 }
 0x2c2   :  { %v905_v18 = vmul.f32 %v2672_v33, %v876_v16 }
 0x2c4   :  { %v926_v20 = vadd.f32 %v2678_v19, %v905_v18 }
 0x2c6   :  { %v942_v22 = vmax.f32 %v926_v20, 0.0 }
 0x2c8   :  { %v952_v23 = vpack.c.bf16 %v942_v22, %v941_v21 }
 0x2c9   :  { %v879_v24 = vpop.f32.mrf.mxu2 }
 0x2ca   :  { %1053 = vmatmul.bf16.gmra.mxu3 %v952_v23  ;;  %v906_v25 = vmul.f32 %v2672_v33, %v879_v24 }
 0x2cc   :  { %v927_v27 = vadd.f32 %v2678_v19, %v906_v25 }
 0x2ce   :  { %v943_v30 = vmax.f32 %v927_v27, 0.0 }
 0x2d1   :  { %v881_v26 = vpop.f32.mrf.mxu2 }
 0x2d2   :  { %v907_v28 = vmul.f32 %v2672_v33, %v881_v26 }
 0x2d4   :  { %v928_v29 = vadd.f32 %v2678_v19, %v907_v28 }
 0x2d6   :  { %v944_v31 = vmax.f32 %v928_v29, 0.0 }
 0x2d8   :  { %v953_v32 = vpack.c.bf16 %v944_v31, %v943_v30 }
 0x2d9   :  { %v884_v34 = vpop.f32.mrf.mxu2 }
 0x2da   :  { %1058 = vmatmul.bf16.gmra.mxu3 %v953_v32  ;;  %v908_v35 = vmul.f32 %v2672_v33, %v884_v34 }
 0x2dc   :  { %v929_v37 = vadd.f32 %v2678_v19, %v908_v35 }
 0x2de   :  { %v945_v41 = vmax.f32 %v929_v37, 0.0 }
 0x2e1   :  { %v886_v36 = vpop.f32.mrf.mxu2 }
 0x2e2   :  { %v909_v38 = vmul.f32 %v2672_v33, %v886_v36 }
 0x2e4   :  { %v930_v40 = vadd.f32 %v2678_v19, %v909_v38 }
 0x2e6   :  { %v946_v42 = vmax.f32 %v930_v40, 0.0 }
 0x2e8   :  { %v954_v43 = vpack.c.bf16 %v946_v42, %v945_v41 }
 0x2ea   :  { %1063 = vmatmul.bf16.gmra.mxu3 %v954_v43 }
 0x2fd   :  { %v1029_v46 = vpop.f32.mrf.mxu3 }
 0x2fe   :  { %v1074_v47 = vmul.f32 %v2714_v44, %v1029_v46 }
 0x300   :  { %v1095_v33 = vadd.f32 %v2719_v45, %v1074_v47 }
 0x302   :  { %v1111_v19 = vmax.f32 %v1095_v33, 0.0 }
 0x304   :  { %1127 = vst [vmem:[#allocation2] sm:$0xff] %v1111_v19 }
 0x305   :  { %v1031_v48 = vpop.f32.mrf.mxu3 }
 0x306   :  { %v1075_v49 = vmul.f32 %v2714_v44, %v1031_v48 }
 0x308   :  { %v1096_v50 = vadd.f32 %v2719_v45, %v1075_v49 }
 0x30a   :  { %v1112_v51 = vmax.f32 %v1096_v50, 0.0 }
 0x30c   :  { %1128 = vst [vmem:[#allocation2 + $0x8] sm:$0xff] %v1112_v51 }
 0x30d   :  { %v1034_v53 = vpop.f32.mrf.mxu3 }
 0x30e   :  { %v1076_v54 = vmul.f32 %v2714_v44, %v1034_v53 }
 0x310   :  { %v1097_v55 = vadd.f32 %v2719_v45, %v1076_v54 }
 0x312   :  { %v1113_v56 = vmax.f32 %v1097_v55, 0.0 }
 0x314   :  { %1129 = vst [vmem:[#allocation2 + $0x10] sm:$0xff] %v1113_v56 }
 0x315   :  { %v1036_v57 = vpop.f32.mrf.mxu3 }
 0x316   :  { %v1077_v58 = vmul.f32 %v2714_v44, %v1036_v57 }
 0x318   :  { %v1098_v59 = vadd.f32 %v2719_v45, %v1077_v58 }
 0x31a   :  { %v1114_v60 = vmax.f32 %v1098_v59, 0.0 }
 0x31c   :  { %1130 = vst [vmem:[#allocation2 + $0x18] sm:$0xff] %v1114_v60 }
 0x31d   :  { %v1039_v61 = vpop.f32.mrf.mxu3 }
 0x31e   :  { %v1078_v0 = vmul.f32 %v2714_v44, %v1039_v61 }
 0x320   :  { %v1099_v1 = vadd.f32 %v2719_v45, %v1078_v0 }
 0x322   :  { %v1115_v39 = vmax.f32 %v1099_v1, 0.0 }
 0x324   :  { %1131 = vst [vmem:[#allocation2 + $0x20] sm:$0xff] %v1115_v39 }
 0x325   :  { %v1041_v52 = vpop.f32.mrf.mxu3 }
 0x326   :  { %v1079_v2 = vmul.f32 %v2714_v44, %v1041_v52 }
 0x328   :  { %v1100_v3 = vadd.f32 %v2719_v45, %v1079_v2 }
 0x32a   :  { %v1116_v4 = vmax.f32 %v1100_v3, 0.0 }
 0x32c   :  { %1132 = vst [vmem:[#allocation2 + $0x28] sm:$0xff] %v1116_v4 }
 0x32d   :  { %v1044_v5 = vpop.f32.mrf.mxu3 }
 0x32e   :  { %v1080_v6 = vmul.f32 %v2714_v44, %v1044_v5 }
 0x330   :  { %v1101_v62 = vadd.f32 %v2719_v45, %v1080_v6 }
 0x332   :  { %v1117_v63 = vmax.f32 %v1101_v62, 0.0 }
 0x334   :  { %1133 = vst [vmem:[#allocation2 + $0x30] sm:$0xff] %v1117_v63 }
 0x335   :  { %v1046_v7 = vpop.f32.mrf.mxu3 }
 0x336   :  { %v1081_v8 = vmul.f32 %v2714_v44, %v1046_v7 }
 0x338   :  { %v1102_v9 = vadd.f32 %v2719_v45, %v1081_v8 }
 0x33a   :  { %v1118_v10 = vmax.f32 %v1102_v9, 0.0 }
 0x33c   :  { %1134 = vst [vmem:[#allocation2 + $0x38] sm:$0xff] %v1118_v10 }
 0x33d   :  { %v1049_v11 = vpop.f32.mrf.mxu3 }
 0x33e   :  { %v1082_v12 = vmul.f32 %v2714_v44, %v1049_v11 }
 0x340   :  { %v1103_v13 = vadd.f32 %v2719_v45, %v1082_v12 }
 0x342   :  { %v1119_v14 = vmax.f32 %v1103_v13, 0.0 }
 0x344   :  { %1135 = vst [vmem:[#allocation2 + $0x40] sm:$0xff] %v1119_v14 }
 0x345   :  { %v1051_v15 = vpop.f32.mrf.mxu3 }
 0x346   :  { %v1083_v16 = vmul.f32 %v2714_v44, %v1051_v15 }
 0x348   :  { %v1104_v17 = vadd.f32 %v2719_v45, %v1083_v16 }
 0x34a   :  { %v1120_v18 = vmax.f32 %v1104_v17, 0.0 }
 0x34c   :  { %1136 = vst [vmem:[#allocation2 + $0x48] sm:$0xff] %v1120_v18 }
 0x34d   :  { %v1054_v20 = vpop.f32.mrf.mxu3 }
 0x34e   :  { %v1084_v21 = vmul.f32 %v2714_v44, %v1054_v20 }
 0x350   :  { %v1105_v22 = vadd.f32 %v2719_v45, %v1084_v21 }
 0x352   :  { %v1121_v23 = vmax.f32 %v1105_v22, 0.0 }
 0x354   :  { %1137 = vst [vmem:[#allocation2 + $0x50] sm:$0xff] %v1121_v23 }
 0x355   :  { %v1056_v24 = vpop.f32.mrf.mxu3 }
 0x356   :  { %v1085_v25 = vmul.f32 %v2714_v44, %v1056_v24 }
 0x358   :  { %v1106_v26 = vadd.f32 %v2719_v45, %v1085_v25 }
 0x35a   :  { %v1122_v27 = vmax.f32 %v1106_v26, 0.0 }
 0x35c   :  { %1138 = vst [vmem:[#allocation2 + $0x58] sm:$0xff] %v1122_v27 }
 0x35d   :  { %v1059_v28 = vpop.f32.mrf.mxu3 }
 0x35e   :  { %v1086_v29 = vmul.f32 %v2714_v44, %v1059_v28 }
 0x360   :  { %v1107_v30 = vadd.f32 %v2719_v45, %v1086_v29 }
 0x362   :  { %v1123_v31 = vmax.f32 %v1107_v30, 0.0 }
 0x364   :  { %1139 = vst [vmem:[#allocation2 + $0x60] sm:$0xff] %v1123_v31 }
 0x365   :  { %v1061_v32 = vpop.f32.mrf.mxu3 }
 0x366   :  { %v1087_v34 = vmul.f32 %v2714_v44, %v1061_v32 }
 0x368   :  { %v1108_v35 = vadd.f32 %v2719_v45, %v1087_v34 }
 0x36a   :  { %v1124_v36 = vmax.f32 %v1108_v35, 0.0 }
 0x36c   :  { %1140 = vst [vmem:[#allocation2 + $0x68] sm:$0xff] %v1124_v36 }
 0x36d   :  { %v1064_v37 = vpop.f32.mrf.mxu3 }
 0x36e   :  { %v1088_v38 = vmul.f32 %v2714_v44, %v1064_v37 }
 0x370   :  { %v1109_v40 = vadd.f32 %v2719_v45, %v1088_v38 }
 0x372   :  { %v1125_v41 = vmax.f32 %v1109_v40, 0.0 }
 0x374   :  { %1141 = vst [vmem:[#allocation2 + $0x70] sm:$0xff] %v1125_v41 }
 0x375   :  { %v1066_v42 = vpop.f32.mrf.mxu3 }
 0x376   :  { %v1089_v43 = vmul.f32 %v2714_v44, %v1066_v42 }
 0x378   :  { %v1110_v46 = vadd.f32 %v2719_v45, %v1089_v43 }
 0x37a   :  { %v1126_v47 = vmax.f32 %v1110_v46, 0.0 }
 0x37c   :  { %1142 = vst [vmem:[#allocation2 + $0x78] sm:$0xff] %v1126_v47 }
 0x37d LB: > { %s1165_s26 = sld [smem:[#allocation8 + %s2365_s25]]  ;;  %s1169_s30 = scalar_lea.vmem [#allocation12], %s2365_s25  ;;  %s2365_s25 = sphi %s2363_s25, %s1164_s25  }
 0x37e   : > { %s1166_s29 = sld [smem:[#allocation10 + %s2365_s25]]  ;;  %v1170_v33 = vld [vmem:[%s1169_s30] sm:$0x1]  ;;  %s1164_s25 = sadd.s32 1, %s2365_s25  }
 0x37f   : > { %p1161_p2 = scmp.ge.s32.totalorder %s1164_s25, 32  }
 0x380   :  { %v2065_v44 = vld [vmem:[#allocation14 + $0xb8] sm:$0xff] (%p1161_p2)  ;;  %v2064_v45 = vld [vmem:[#allocation14 + $0xb0] sm:$0xff] (%p1161_p2)  ;;  %v2063_v53 = vld [vmem:[#allocation14 + $0xa8] sm:$0xff] (%p1161_p2)  ;;  %s1925_s18 = sld [smem:[#allocation4 + $0x2]] (%p1161_p2)  ;;  %s2381_s7 = smov (%p1161_p2), [#allocation18]  }
 0x381   :  { %1316 = vmatpush.bf16.msrb.mxu0 (%p1161_p2), %v2065_v44  ;;  %v2062_v54 = vld [vmem:[#allocation14 + $0xa0] sm:$0xff] (%p1161_p2)  ;;  %v2061_v55 = vld [vmem:[#allocation14 + $0x98] sm:$0xff] (%p1161_p2)  ;;  %v2060_v56 = vld [vmem:[#allocation14 + $0x90] sm:$0xff] (%p1161_p2)  ;;  %s1752_s13 = sshll.u32 (%p1161_p2), %s2381_s7, 4  ;;  %s1754_s4 = sshll.u32 (%p1161_p2), %s2891_s15, 4  ;;  %s1753_s13 = int_to_ptr.vmem [resolvable:$true] %s1752_s13  ;;  %s1755_s4 = int_to_ptr.hbm [resolvable:$true] %s1754_s4 }
 0x382   :  { %v1178_v57 = vld [vmem:[#allocation2] sm:$0xff] (%p1161_p2)  ;;  %v1179_v58 = vld [vmem:[#allocation2 + $0x8] sm:$0xff] (%p1161_p2)  ;;  %v1180_v5 = vld [vmem:[#allocation2 + $0x10] sm:$0xff] (%p1161_p2) }
 0x383   : > { %s1167_s0 = scalar_lea.vmem [#allocation2], %s1165_s26  ;;  %v2059_v0 = vld [vmem:[#allocation14 + $0x88] sm:$0xff] (%p1161_p2)  ;;  %v2058_v3 = vld [vmem:[#allocation14 + $0x80] sm:$0xff] (%p1161_p2)  ;;  %v1181_v6 = vld [vmem:[#allocation2 + $0x18] sm:$0xff] (%p1161_p2) }
 0x384   : > { %v1168_v19 = vld [vmem:[%s1167_s0] sm:$0x1]  ;;  %s1173_s1 = scalar_lea.vmem [#allocation3], %s1166_s29  ;;  %v1183_v13 = vld [vmem:[#allocation2 + $0x28] sm:$0xff] (%p1161_p2)  ;;  %v1184_v22 = vld [vmem:[#allocation2 + $0x30] sm:$0xff] (%p1161_p2) }
 0x385   : > { %v1171_v48 = vadd.f32 %v1170_v33, %v1168_v19  ;;  %v1174_v49 = vld [vmem:[%s1173_s1] sm:$0x1]  ;;  %1317 = vmatpush.bf16.msrb.mxu0 (%p1161_p2), %v2064_v45  ;;  %v1185_v23 = vld [vmem:[#allocation2 + $0x38] sm:$0xff] (%p1161_p2)  ;;  %v1187_v32 = vld [vmem:[#allocation2 + $0x48] sm:$0xff] (%p1161_p2) }
 0x386   :  { %v2753_v59 = vstv (%p1161_p2), %s1925_s18  ;;  %v1182_v12 = vld [vmem:[#allocation2 + $0x20] sm:$0xff] (%p1161_p2)  ;;  %v2073_v42 = vld [vmem:[#allocation15 + $0xb8] sm:$0xff] (%p1161_p2)  ;;  %v1188_v43 = vld [vmem:[#allocation2 + $0x50] sm:$0xff] (%p1161_p2) }
 0x387   : > { %v1172_v50 = vmax.f32 %v1171_v48, 0.0  ;;  %1163 = sbr.rel (!%p1161_p2) target bundleno = 893 (0x37d), region = 176  ;;  %v1195_v60 = vmul.f32 (%p1161_p2), %v2753_v59, %v1178_v57  ;;  %v1196_v61 = vmul.f32 (%p1161_p2), %v2753_v59, %v1179_v58  ;;  %v1197_v62 = vmul.f32 (%p1161_p2), %v2753_v59, %v1180_v5  ;;  %v1186_v31 = vld [vmem:[#allocation2 + $0x40] sm:$0xff] (%p1161_p2)  ;;  %v1189_v46 = vld [vmem:[#allocation2 + $0x58] sm:$0xff] (%p1161_p2)  ;;  %1496 = vmatpush.bf16.msrb.mxu1 (%p1161_p2), %v2073_v42  ;;  %v2072_v44 = vld [vmem:[#allocation15 + $0xb0] sm:$0xff] (%p1161_p2) }
 0x388   :  { %v1198_v63 = vmul.f32 (%p1161_p2), %v2753_v59, %v1181_v6  ;;  %v1199_v14 = vmul.f32 (%p1161_p2), %v2753_v59, %v1182_v12  ;;  %v1200_v15 = vmul.f32 (%p1161_p2), %v2753_v59, %v1183_v13  ;;  %v1201_v24 = vmul.f32 (%p1161_p2), %v2753_v59, %v1184_v22  ;;  %v1190_v45 = vld [vmem:[#allocation2 + $0x60] sm:$0xff] (%p1161_p2) }
 0x389   : > { %v1175_v51 = vadd.f32 %v1174_v49, %v1172_v50  ;;  %1318 = vmatpush.bf16.msrb.mxu0 (%p1161_p2), %v2063_v53  ;;  %v1202_v25 = vmul.f32 (%p1161_p2), %v2753_v59, %v1185_v23  ;;  %v1203_v34 = vmul.f32 (%p1161_p2), %v2753_v59, %v1186_v31  ;;  %v1204_v35 = vmul.f32 (%p1161_p2), %v2753_v59, %v1187_v32  ;;  %v1191_v53 = vld [vmem:[#allocation2 + $0x68] sm:$0xff] (%p1161_p2)  ;;  %v2774_v12 = vld [vmem:[%s2884_s8 + $0x2] ss:$0 sm:$0xff] (%p1161_p2) }
 0x38a   :  { %v1205_v47 = vmul.f32 (%p1161_p2), %v2753_v59, %v1188_v43  ;;  %v1206_v33 = vmul.f32 (%p1161_p2), %v2753_v59, %v1189_v46 }
 0x38b   : > { %1176 = vst [vmem:[%s1173_s1] sm:$0x1] %v1175_v51  ;;  %1497 = vmatpush.bf16.msrb.mxu1 (%p1161_p2), %v2072_v44 }
 0x38d   :  { %1319 = vmatpush.bf16.msrb.mxu0 %v2062_v54  ;;  %v2071_v54 = vld [vmem:[#allocation15 + $0xa8] sm:$0xff] }
 0x38f   :  { %1498 = vmatpush.bf16.msrb.mxu1 %v2071_v54 }
 0x391   :  { %1320 = vmatpush.bf16.msrb.mxu0 %v2061_v55  ;;  %v1207_v55 = vmul.f32 %v2753_v59, %v1190_v45 }
 0x392   :  { %v1211_v1 = vld [vmem:[#allocation3] sm:$0xff]  ;;  %v1212_v39 = vld [vmem:[#allocation3 + $0x8] sm:$0xff]  ;;  %v1213_v7 = vld [vmem:[#allocation3 + $0x10] sm:$0xff] }
 0x393   :  { %v1227_v52 = vadd.f32 %v1211_v1, %v1195_v60  ;;  %v1228_v2 = vadd.f32 %v1212_v39, %v1196_v61  ;;  %v1214_v8 = vld [vmem:[#allocation3 + $0x18] sm:$0xff]  ;;  %v1229_v9 = vadd.f32 %v1213_v7, %v1197_v62  ;;  %v1215_v16 = vld [vmem:[#allocation3 + $0x20] sm:$0xff]  ;;  %v1216_v17 = vld [vmem:[#allocation3 + $0x28] sm:$0xff] }
 0x394   :  { %v1230_v10 = vadd.f32 %v1214_v8, %v1198_v63  ;;  %v1231_v18 = vadd.f32 %v1215_v16, %v1199_v14  ;;  %v1232_v20 = vadd.f32 %v1216_v17, %v1200_v15  ;;  %v1217_v26 = vld [vmem:[#allocation3 + $0x30] sm:$0xff]  ;;  %v1218_v27 = vld [vmem:[#allocation3 + $0x38] sm:$0xff]  ;;  %v1219_v36 = vld [vmem:[#allocation3 + $0x40] sm:$0xff] }
 0x395   :  { %1321 = vmatpush.bf16.msrb.mxu0 %v2060_v56  ;;  %v1243_v4 = vpack.c.bf16 %v1228_v2, %v1227_v52  ;;  %v1233_v28 = vadd.f32 %v1217_v26, %v1201_v24  ;;  %v1234_v29 = vadd.f32 %v1218_v27, %v1202_v25  ;;  %v1220_v37 = vld [vmem:[#allocation3 + $0x48] sm:$0xff]  ;;  %v1235_v38 = vadd.f32 %v1219_v36, %v1203_v34  ;;  %v1221_v19 = vld [vmem:[#allocation3 + $0x50] sm:$0xff]  ;;  %v1222_v48 = vld [vmem:[#allocation3 + $0x58] sm:$0xff] }
 0x396   :  { %v1244_v11 = vpack.c.bf16 %v1230_v10, %v1229_v9  ;;  %v1245_v21 = vpack.c.bf16 %v1232_v20, %v1231_v18  ;;  %v1236_v40 = vadd.f32 %v1220_v37, %v1204_v35  ;;  %v1237_v49 = vadd.f32 %v1221_v19, %v1205_v47  ;;  %v1223_v57 = vld [vmem:[#allocation3 + $0x60] sm:$0xff]  ;;  %v1224_v58 = vld [vmem:[#allocation3 + $0x68] sm:$0xff]  ;;  %v2069_v39 = vld [vmem:[#allocation15 + $0x98] sm:$0xff] }
 0x397   :  { %v1246_v30 = vpack.c.bf16 %v1234_v29, %v1233_v28  ;;  %v1238_v50 = vadd.f32 %v1222_v48, %v1206_v33  ;;  %v1208_v56 = vmul.f32 %v2753_v59, %v1191_v53  ;;  %v2070_v60 = vld [vmem:[#allocation15 + $0xa0] sm:$0xff]  ;;  %v1239_v61 = vadd.f32 %v1223_v57, %v1207_v55  ;;  %v1192_v52 = vld [vmem:[#allocation2 + $0x70] sm:$0xff]  ;;  %v1193_v2 = vld [vmem:[#allocation2 + $0x78] sm:$0xff] }
 0x398   :  { %v1247_v41 = vpack.c.bf16 %v1236_v40, %v1235_v38  ;;  %1499 = vmatpush.bf16.msrb.mxu1 %v2070_v60  ;;  %v1210_v5 = vmul.f32 %v2753_v59, %v1193_v2  ;;  %v1225_v6 = vld [vmem:[#allocation3 + $0x70] sm:$0xff]  ;;  %v1226_v62 = vld [vmem:[#allocation3 + $0x78] sm:$0xff]  ;;  %v2067_v63 = vld [vmem:[#allocation15 + $0x88] sm:$0xff] }
 0x399   :  { %1322 = vmatpush.bf16.msrb.mxu0 %v2059_v0  ;;  %v1248_v51 = vpack.c.bf16 %v1238_v50, %v1237_v49  ;;  %v1240_v0 = vadd.f32 %v1224_v58, %v1208_v56  ;;  %v2066_v9 = vld [vmem:[#allocation15 + $0x80] sm:$0xff] }
 0x39a   :  { %v1242_v8 = vadd.f32 %v1226_v62, %v1210_v5 }
 0x39b   :  { %v1249_v1 = vpack.c.bf16 %v1240_v0, %v1239_v61 }
 0x39c   :  { %1500 = vmatpush.bf16.msrb.mxu1 %v2069_v39 }
 0x39d   :  { %1323 = vmatpush.bf16.msrb.mxu0 %v2058_v3  ;;  %v2068_v3 = vld [vmem:[#allocation15 + $0x90] sm:$0xff] }
 0x3a0   :  { %1324 = vmatmul.bf16.vlgmr.msrb.gmra.mxu0 %v1243_v4  ;;  %1501 = vmatpush.bf16.msrb.mxu1 %v2068_v3  ;;  %v1209_v4 = vmul.f32 %v2753_v59, %v1192_v52  ;;  %v2780_v59 = vld [vmem:[%s2885_s9 + $0x2] ss:$0 sm:$0xff] }
 0x3a2   :  { %v1241_v7 = vadd.f32 %v1225_v6, %v1209_v4 }
 0x3a4   :  { %1502 = vmatpush.bf16.msrb.mxu1 %v2067_v63  ;;  %v1250_v10 = vpack.c.bf16 %v1242_v8, %v1241_v7 }
 0x3a8   :  { %1503 = vmatpush.bf16.msrb.mxu1 %v2066_v9 }
 0x3b0   :  { %1329 = vmatmul.bf16.gmra.mxu0 %v1244_v11 }
 0x3c0   :  { %1334 = vmatmul.bf16.gmra.mxu0 %v1245_v21 }
 0x3d0   :  { %1339 = vmatmul.bf16.gmra.mxu0 %v1246_v30 }
 0x3e0   :  { %1344 = vmatmul.bf16.gmra.mxu0 %v1247_v41 }
 0x3f0   :  { %1349 = vmatmul.bf16.gmra.mxu0 %v1248_v51 }
 0x400   :  { %1354 = vmatmul.bf16.gmra.mxu0 %v1249_v1 }
 0x410   :  { %1359 = vmatmul.bf16.gmra.mxu0 %v1250_v10 }
 0x41d   :  { %v1325_v11 = vpop.f32.mrf.mxu0 }
 0x41e   :  { %v1370_v13 = vmul.f32 %v2774_v12, %v1325_v11 }
 0x420   :  { %v1391_v15 = vadd.f32 %v2780_v59, %v1370_v13 }
 0x422   :  { %v1407_v18 = vmax.f32 %v1391_v15, 0.0 }
 0x425   :  { %v1327_v14 = vpop.f32.mrf.mxu0 }
 0x426   :  { %v1371_v16 = vmul.f32 %v2774_v12, %v1327_v14 }
 0x428   :  { %v1392_v17 = vadd.f32 %v2780_v59, %v1371_v16 }
 0x42a   :  { %v1408_v20 = vmax.f32 %v1392_v17, 0.0 }
 0x42c   :  { %v1423_v21 = vpack.c.bf16 %v1408_v20, %v1407_v18 }
 0x42d   :  { %v1330_v22 = vpop.f32.mrf.mxu0 }
 0x42e   :  { %1504 = vmatmul.bf16.vlgmr.msrb.gmra.mxu1 %v1423_v21  ;;  %v1372_v23 = vmul.f32 %v2774_v12, %v1330_v22 }
 0x430   :  { %v1393_v25 = vadd.f32 %v2780_v59, %v1372_v23  ;;  %v2816_v23 = vld [vmem:[%s2887_s11 + $0x2] ss:$0 sm:$0xff] }
 0x432   :  { %v1409_v28 = vmax.f32 %v1393_v25, 0.0 }
 0x435   :  { %v1332_v24 = vpop.f32.mrf.mxu0 }
 0x436   :  { %v1373_v26 = vmul.f32 %v2774_v12, %v1332_v24  ;;  %v2821_v24 = vld [vmem:[%s2888_s12 + $0x2] ss:$0 sm:$0xff] }
 0x438   :  { %v1394_v27 = vadd.f32 %v2780_v59, %v1373_v26 }
 0x43a   :  { %v1410_v29 = vmax.f32 %v1394_v27, 0.0 }
 0x43c   :  { %v1424_v30 = vpack.c.bf16 %v1410_v29, %v1409_v28 }
 0x43d   :  { %v1335_v31 = vpop.f32.mrf.mxu0 }
 0x43e   :  { %1509 = vmatmul.bf16.gmra.mxu1 %v1424_v30  ;;  %v1374_v32 = vmul.f32 %v2774_v12, %v1335_v31 }
 0x440   :  { %v1395_v35 = vadd.f32 %v2780_v59, %v1374_v32 }
 0x442   :  { %v1411_v38 = vmax.f32 %v1395_v35, 0.0 }
 0x445   :  { %v1337_v34 = vpop.f32.mrf.mxu0 }
 0x446   :  { %v1375_v36 = vmul.f32 %v2774_v12, %v1337_v34 }
 0x448   :  { %v1396_v37 = vadd.f32 %v2780_v59, %v1375_v36 }
 0x44a   :  { %v1412_v40 = vmax.f32 %v1396_v37, 0.0 }
 0x44c   :  { %v1425_v41 = vpack.c.bf16 %v1412_v40, %v1411_v38 }
 0x44d   :  { %v1340_v42 = vpop.f32.mrf.mxu0 }
 0x44e   :  { %1514 = vmatmul.bf16.gmra.mxu1 %v1425_v41  ;;  %v1376_v43 = vmul.f32 %v2774_v12, %v1340_v42 }
 0x450   :  { %v1397_v47 = vadd.f32 %v2780_v59, %v1376_v43 }
 0x452   :  { %v1413_v48 = vmax.f32 %v1397_v47, 0.0 }
 0x455   :  { %v1342_v46 = vpop.f32.mrf.mxu0 }
 0x456   :  { %v1377_v33 = vmul.f32 %v2774_v12, %v1342_v46 }
 0x458   :  { %v1398_v19 = vadd.f32 %v2780_v59, %v1377_v33 }
 0x45a   :  { %v1414_v49 = vmax.f32 %v1398_v19, 0.0 }
 0x45c   :  { %v1426_v50 = vpack.c.bf16 %v1414_v49, %v1413_v48 }
 0x45d   :  { %v1345_v51 = vpop.f32.mrf.mxu0 }
 0x45e   :  { %1519 = vmatmul.bf16.gmra.mxu1 %v1426_v50  ;;  %v1378_v44 = vmul.f32 %v2774_v12, %v1345_v51 }
 0x460   :  { %v1399_v53 = vadd.f32 %v2780_v59, %v1378_v44 }
 0x462   :  { %v1415_v56 = vmax.f32 %v1399_v53, 0.0 }
 0x465   :  { %v1347_v45 = vpop.f32.mrf.mxu0 }
 0x466   :  { %v1379_v54 = vmul.f32 %v2774_v12, %v1347_v45 }
 0x468   :  { %v1400_v55 = vadd.f32 %v2780_v59, %v1379_v54 }
 0x46a   :  { %v1416_v57 = vmax.f32 %v1400_v55, 0.0 }
 0x46c   :  { %v1427_v58 = vpack.c.bf16 %v1416_v57, %v1415_v56 }
 0x46d   :  { %v1350_v60 = vpop.f32.mrf.mxu0 }
 0x46e   :  { %1524 = vmatmul.bf16.gmra.mxu1 %v1427_v58  ;;  %v1380_v61 = vmul.f32 %v2774_v12, %v1350_v60 }
 0x470   :  { %v1401_v1 = vadd.f32 %v2780_v59, %v1380_v61 }
 0x472   :  { %v1417_v2 = vmax.f32 %v1401_v1, 0.0 }
 0x475   :  { %v1352_v0 = vpop.f32.mrf.mxu0 }
 0x476   :  { %v1381_v39 = vmul.f32 %v2774_v12, %v1352_v0 }
 0x478   :  { %v1402_v52 = vadd.f32 %v2780_v59, %v1381_v39 }
 0x47a   :  { %v1418_v3 = vmax.f32 %v1402_v52, 0.0 }
 0x47c   :  { %v1428_v4 = vpack.c.bf16 %v1418_v3, %v1417_v2 }
 0x47d   :  { %v1355_v5 = vpop.f32.mrf.mxu0 }
 0x47e   :  { %1529 = vmatmul.bf16.gmra.mxu1 %v1428_v4  ;;  %v1382_v6 = vmul.f32 %v2774_v12, %v1355_v5 }
 0x480   :  { %v1403_v63 = vadd.f32 %v2780_v59, %v1382_v6 }
 0x482   :  { %v1419_v9 = vmax.f32 %v1403_v63, 0.0 }
 0x485   :  { %v1357_v62 = vpop.f32.mrf.mxu0 }
 0x486   :  { %v1383_v7 = vmul.f32 %v2774_v12, %v1357_v62 }
 0x488   :  { %v1404_v8 = vadd.f32 %v2780_v59, %v1383_v7 }
 0x48a   :  { %v1420_v10 = vmax.f32 %v1404_v8, 0.0 }
 0x48c   :  { %v1429_v11 = vpack.c.bf16 %v1420_v10, %v1419_v9 }
 0x48d   :  { %v1360_v13 = vpop.f32.mrf.mxu0 }
 0x48e   :  { %1534 = vmatmul.bf16.gmra.mxu1 %v1429_v11  ;;  %v1384_v14 = vmul.f32 %v2774_v12, %v1360_v13 }
 0x490   :  { %v1405_v16 = vadd.f32 %v2780_v59, %v1384_v14 }
 0x492   :  { %v1421_v20 = vmax.f32 %v1405_v16, 0.0 }
 0x495   :  { %v1362_v15 = vpop.f32.mrf.mxu0 }
 0x496   :  { %v1385_v17 = vmul.f32 %v2774_v12, %v1362_v15 }
 0x498   :  { %v1406_v18 = vadd.f32 %v2780_v59, %v1385_v17 }
 0x49a   :  { %v1422_v21 = vmax.f32 %v1406_v18, 0.0 }
 0x49c   :  { %v1430_v22 = vpack.c.bf16 %v1422_v21, %v1421_v20 }
 0x49e   :  { %1539 = vmatmul.bf16.gmra.mxu1 %v1430_v22 }
 0x4ab   :  { %v1505_v25 = vpop.f32.mrf.mxu1 }
 0x4ac   :  { %v1550_v26 = vmul.f32 %v2816_v23, %v1505_v25 }
 0x4ae   :  { %v1571_v12 = vadd.f32 %v2821_v24, %v1550_v26 }
 0x4b0   :  { %v1587_v59 = vmax.f32 %v1571_v12, 0.0 }
 0x4b2   :  { %1603 = vst [vmem:[#allocation2] sm:$0xff] %v1587_v59 }
 0x4b3   :  { %v1507_v27 = vpop.f32.mrf.mxu1 }
 0x4b4   :  { %v1551_v28 = vmul.f32 %v2816_v23, %v1507_v27 }
 0x4b6   :  { %v1572_v29 = vadd.f32 %v2821_v24, %v1551_v28 }
 0x4b8   :  { %v1588_v30 = vmax.f32 %v1572_v29, 0.0 }
 0x4ba   :  { %1604 = vst [vmem:[#allocation2 + $0x8] sm:$0xff] %v1588_v30  ;;  %v2827_v31 = vpack.c.bf16 %v1588_v30, %v1587_v59  ;;  %v1657_v30 = vld [vmem:[%s2882_s6] sm:$0xff] }
 0x4bb   :  { %v1510_v32 = vpop.f32.mrf.mxu1 }
 0x4bc   :  { %v1552_v34 = vmul.f32 %v2816_v23, %v1510_v32  ;;  %v2081_v32 = vld [vmem:[#allocation17 + $0x38] sm:$0xff] }
 0x4bd   :  { %1733 = vmatpush.bf16.msra.mxu3 %v2081_v32 }
 0x4be   :  { %v1573_v35 = vadd.f32 %v2821_v24, %v1552_v34  ;;  %v2380_v34 = vmov 0  }
 0x4bf   :  { %2145 = vset.pattern.permute.xlu0 %v2380_v34 }
 0x4c0   :  { %v1589_v36 = vmax.f32 %v1573_v35, 0.0  ;;  %1660 = vperm.xlu0 %2145, %v1657_v30   ;;  %v2080_v35 = vld [vmem:[#allocation17 + $0x30] sm:$0xff] }
 0x4c1   :  { %1734 = vmatpush.bf16.msra.mxu3 %v2080_v35 }
 0x4c2   :  { %1605 = vst [vmem:[#allocation2 + $0x10] sm:$0xff] %v1589_v36 }
 0x4c3   :  { %v1512_v37 = vpop.f32.mrf.mxu1 }
 0x4c4   :  { %v1553_v38 = vmul.f32 %v2816_v23, %v1512_v37 }
 0x4c6   :  { %v1574_v40 = vadd.f32 %v2821_v24, %v1553_v38 }
 0x4c8   :  { %v1590_v41 = vmax.f32 %v1574_v40, 0.0  ;;  %v2077_v40 = vld [vmem:[#allocation17 + $0x18] sm:$0xff] }
 0x4ca   :  { %1606 = vst [vmem:[#allocation2 + $0x18] sm:$0xff] %v1590_v41  ;;  %v2833_v42 = vpack.c.bf16 %v1590_v41, %v1589_v36  ;;  %v2076_v41 = vld [vmem:[#allocation17 + $0x10] sm:$0xff] }
 0x4cb   :  { %v1515_v43 = vpop.f32.mrf.mxu1 }
 0x4cc   :  { %v1554_v46 = vmul.f32 %v2816_v23, %v1515_v43  ;;  %v2075_v43 = vld [vmem:[#allocation17 + $0x8] sm:$0xff] }
 0x4ce   :  { %v1575_v47 = vadd.f32 %v2821_v24, %v1554_v46  ;;  %v1619_v46 = vld [vmem:[%s2881_s5] sm:$0xf] }
 0x4d0   :  { %v1591_v33 = vmax.f32 %v1575_v47, 0.0  ;;  %v2074_v47 = vld [vmem:[#allocation17] sm:$0xff] }
 0x4d2   :  { %1607 = vst [vmem:[#allocation2 + $0x20] sm:$0xff] %v1591_v33 }
 0x4d3   :  { %v1517_v19 = vpop.f32.mrf.mxu1 }
 0x4d4   :  { %v1555_v48 = vmul.f32 %v2816_v23, %v1517_v19 }
 0x4d6   :  { %v1576_v49 = vadd.f32 %v2821_v24, %v1555_v48 }
 0x4d8   :  { %v1592_v50 = vmax.f32 %v1576_v49, 0.0 }
 0x4da   :  { %1608 = vst [vmem:[#allocation2 + $0x28] sm:$0xff] %v1592_v50  ;;  %v2839_v51 = vpack.c.bf16 %v1592_v50, %v1591_v33 }
 0x4db   :  { %v1520_v44 = vpop.f32.mrf.mxu1 }
 0x4dc   :  { %v1556_v45 = vmul.f32 %v2816_v23, %v1520_v44 }
 0x4de   :  { %v1577_v53 = vadd.f32 %v2821_v24, %v1556_v45 }
 0x4e0   :  { %v1593_v54 = vmax.f32 %v1577_v53, 0.0 }
 0x4e2   :  { %1609 = vst [vmem:[#allocation2 + $0x30] sm:$0xff] %v1593_v54 }
 0x4e3   :  { %v1522_v55 = vpop.f32.mrf.mxu1 }
 0x4e4   :  { %v1557_v56 = vmul.f32 %v2816_v23, %v1522_v55 }
 0x4e6   :  { %v1578_v57 = vadd.f32 %v2821_v24, %v1557_v56 }
 0x4e8   :  { %v1594_v58 = vmax.f32 %v1578_v57, 0.0 }
 0x4ea   :  { %1610 = vst [vmem:[#allocation2 + $0x38] sm:$0xff] %v1594_v58  ;;  %v1639_v60 = vpack.c.bf16 %v1594_v58, %v1593_v54 }
 0x4eb   :  { %v1525_v61 = vpop.f32.mrf.mxu1 }
 0x4ec   :  { %v1558_v0 = vmul.f32 %v2816_v23, %v1525_v61 }
 0x4ee   :  { %v1579_v1 = vadd.f32 %v2821_v24, %v1558_v0 }
 0x4f0   :  { %v1595_v39 = vmax.f32 %v1579_v1, 0.0 }
 0x4f2   :  { %1611 = vst [vmem:[#allocation2 + $0x40] sm:$0xff] %v1595_v39 }
 0x4f3   :  { %v1527_v52 = vpop.f32.mrf.mxu1 }
 0x4f4   :  { %v1559_v2 = vmul.f32 %v2816_v23, %v1527_v52 }
 0x4f6   :  { %v1580_v3 = vadd.f32 %v2821_v24, %v1559_v2 }
 0x4f8   :  { %v1596_v4 = vmax.f32 %v1580_v3, 0.0 }
 0x4fa   :  { %1612 = vst [vmem:[#allocation2 + $0x48] sm:$0xff] %v1596_v4  ;;  %v1640_v38 = vpack.c.bf16 %v1596_v4, %v1595_v39 }
 0x4fb   :  { %v1530_v5 = vpop.f32.mrf.mxu1 }
 0x4fc   :  { %v1560_v6 = vmul.f32 %v2816_v23, %v1530_v5 }
 0x4fe   :  { %v1581_v62 = vadd.f32 %v2821_v24, %v1560_v6 }
 0x500   :  { %v1597_v63 = vmax.f32 %v1581_v62, 0.0 }
 0x502   :  { %1613 = vst [vmem:[#allocation2 + $0x50] sm:$0xff] %v1597_v63 }
 0x503   :  { %v1532_v7 = vpop.f32.mrf.mxu1 }
 0x504   :  { %v1561_v8 = vmul.f32 %v2816_v23, %v1532_v7 }
 0x506   :  { %v1582_v9 = vadd.f32 %v2821_v24, %v1561_v8 }
 0x508   :  { %v1598_v10 = vmax.f32 %v1582_v9, 0.0 }
 0x50a   :  { %1614 = vst [vmem:[#allocation2 + $0x58] sm:$0xff] %v1598_v10  ;;  %v1641_v37 = vpack.c.bf16 %v1598_v10, %v1597_v63 }
 0x50b   :  { %v1535_v11 = vpop.f32.mrf.mxu1 }
 0x50c   :  { %v1562_v13 = vmul.f32 %v2816_v23, %v1535_v11 }
 0x50e   :  { %v1583_v14 = vadd.f32 %v2821_v24, %v1562_v13 }
 0x510   :  { %v1599_v15 = vmax.f32 %v1583_v14, 0.0 }
 0x512   :  { %1615 = vst [vmem:[#allocation2 + $0x60] sm:$0xff] %v1599_v15 }
 0x513   :  { %v1537_v16 = vpop.f32.mrf.mxu1 }
 0x514   :  { %v1563_v17 = vmul.f32 %v2816_v23, %v1537_v16 }
 0x516   :  { %v1584_v18 = vadd.f32 %v2821_v24, %v1563_v17 }
 0x518   :  { %v1600_v20 = vmax.f32 %v1584_v18, 0.0 }
 0x51a   :  { %1616 = vst [vmem:[#allocation2 + $0x68] sm:$0xff] %v1600_v20  ;;  %v1642_v36 = vpack.c.bf16 %v1600_v20, %v1599_v15 }
 0x51b   :  { %v1540_v21 = vpop.f32.mrf.mxu1 }
 0x51c   :  { %v1564_v22 = vmul.f32 %v2816_v23, %v1540_v21 }
 0x51e   :  { %v1585_v25 = vadd.f32 %v2821_v24, %v1564_v22 }
 0x520   :  { %v1601_v26 = vmax.f32 %v1585_v25, 0.0 }
 0x522   :  { %1617 = vst [vmem:[#allocation2 + $0x70] sm:$0xff] %v1601_v26 }
 0x523   :  { %v1542_v12 = vpop.f32.mrf.mxu1 }
 0x524   :  { %v1565_v59 = vmul.f32 %v2816_v23, %v1542_v12  ;;  %v2079_v23 = vld [vmem:[#allocation17 + $0x28] sm:$0xff] }
 0x525   :  { %1735 = vmatpush.bf16.msra.mxu3 %v2079_v23 }
 0x526   :  { %v1586_v27 = vadd.f32 %v2821_v24, %v1565_v59  ;;  %v2078_v24 = vld [vmem:[#allocation17 + $0x20] sm:$0xff] }
 0x528   :  { %v1602_v28 = vmax.f32 %v1586_v27, 0.0 }
 0x529   :  { %1736 = vmatpush.bf16.msra.mxu3 %v2078_v24 }
 0x52a   :  { %1618 = vst [vmem:[#allocation2 + $0x78] sm:$0xff] %v1602_v28  ;;  %v1643_v29 = vpack.c.bf16 %v1602_v28, %v1601_v26 }
 0x52c   :  { %1644 = vmatpush.bf16.msra.mxu2 %v1643_v29 }
 0x52d   :  { %1737 = vmatpush.bf16.msra.mxu3 %v2077_v40 }
 0x530   :  { %1645 = vmatpush.bf16.msra.mxu2 %v1642_v36 }
 0x531   :  { %1738 = vmatpush.bf16.msra.mxu3 %v2076_v41 }
 0x532   :  { %v1661_v33 = vpop.permute.xlu0 %1660 }
 0x534   :  { %1646 = vmatpush.bf16.msra.mxu2 %v1641_v37 }
 0x535   :  { %1739 = vmatpush.bf16.msra.mxu3 %v2075_v43 }
 0x538   :  { %1647 = vmatpush.bf16.msra.mxu2 %v1640_v38 }
 0x539   :  { %1740 = vmatpush.bf16.msra.mxu3 %v2074_v47 }
 0x53c   :  { %1648 = vmatpush.bf16.msra.mxu2 %v1639_v60 }
 0x540   :  { %1649 = vmatpush.bf16.msra.mxu2 %v2839_v51 }
 0x544   :  { %1650 = vmatpush.bf16.msra.mxu2 %v2833_v42  ;;  %v2150_v42 = vld [vmem:[%s2890_s14] ss:$0 sm:$0xff] }
 0x548   :  { %1651 = vmatpush.bf16.msra.mxu2 %v2827_v31 }
 0x54b   :  { %1652 = vmatmul.bf16.vlgmr.msra.gmra.mxu2 %v1619_v46 }
 0x5ce   :  { %v1653_v19 = vpop.f32.mrf.mxu2 }
 0x5cf   :  { %v1663_v48 = vmul.f32 %v1661_v33, %v1653_v19 }
 0x5d1   :  { %v1664_v49 = vpack.c.bf16 %v1663_v48, %v1663_v48 }
 0x5d3   :  { %1741 = vmatmul.bf16.vlgmr.msra.gmra.mxu3 %v1664_v49 }
 0x5d6   :  { %v1655_v50 = vpop.f32.mrf.mxu2 }
 0x656   :  { %v1742_v31 = vpop.f32.mrf.mxu3 }
 0x657   :  { %v1743_v51 = vadd.f32 %v2150_v42, %v1742_v31 }
 0x659   :  { %1746 = vst [vmem:[#allocation18] sm:$0xff] %v1743_v51 }
 0x65a   :  { %1757 = dma.vmem_to_hbm [thread:$0]  %s1753_s13, 128, %s1755_s4, [#allocation6]  }
 0x65e   :  { %v1744_v44 = vpop.f32.mrf.mxu3 }
 0x65f   :  { %2353 = dma.done.wait [#allocation6], 128  }
 0x660   :  { %2354 = vsyncadd [#allocation6], 4294967168 }
 0x661   :  { %1762 = vsyncpa [#allocation5], 1 }
 0x662   :  { %1763 = vsyncpa [#allocation13], 1 }
 0x663   :  { %1764 = vsyncpa [#allocation16], 1 }
 0x664   :  { %1765 = vsyncpa [#allocation6], 1 }
 0x665   :  { %1766 = vsyncpa [#allocation7], 1 }
 0x666   :  { %1767 = vsyncpa [#allocation9], 1 }

</bundles_post_ra>
